<compile_context>
chip_gen: v7x
topology: tpu7x:2x2x1
jax: 0.10.0
libtpu: 0.0.40
codegen_flags: <defaults>
</compile_context>

<pallas_src>
import functools

import jax
import jax.numpy as jnp
from jax.experimental import pallas as pl
from jax.experimental.pallas import tpu as pltpu


def _layernorm(x, gamma, beta, eps=1e-8):
    mean = jnp.mean(x, axis=-1, keepdims=True)
    var = jnp.mean((x - mean) ** 2, axis=-1, keepdims=True)
    return (x - mean) * jax.lax.rsqrt(var + eps) * gamma + beta


# ----------------------------- fused Pallas kernel -------------------------- #

def fused_stack_kernel(x_in_ref, keep_ref, amask_ref,
                       ln1_g_ref, ln1_b_ref,
                       wq_ref, bq_ref, wkv_ref, bkv_ref,
                       wo_ref, bo_ref,
                       ln2_g_ref, ln2_b_ref,
                       w1_ref, b1_ref, w2_ref, b2_ref,
                       lnf_g_ref, lnf_b_ref,
                       out_ref,
                       x_scr,
                       *, num_heads, bt, seq_len):
    """Grid = (batch_tile, layer).  Activation (rows, D) lives in x_scr across the
    layer axis.  Prep ((seqs + pos) * keep) is done in the wrapper; the last
    layer iteration folds in the final LayerNorm and writes the output."""
    l = pl.program_id(1)
    n_layers = pl.num_programs(1)

    @pl.when(l == 0)
    def _():
        x_scr[...] = x_in_ref[...]            # already (seqs + pos) * keep

    x = x_scr[...]                            # (rows, D) f32
    M, D = x.shape
    dh = D // num_heads
    keep = keep_ref[...]                      # (rows, 1) f32 keep-mask
    amask = amask_ref[...]                    # (L, L) additive causal mask

    def mm(a_bf16, w_ref):
        # bf16 MXU operands, f32 accumulation.
        return jnp.dot(a_bf16, w_ref[...], preferred_element_type=jnp.float32)

    # --- causal multi-head self-attention: Q from LN(x); fused K|V from x ---
    # 1/sqrt(dh) is pre-folded into wq / bq (exact: power-of-two scale).
    q_in = _layernorm(x, ln1_g_ref[0], ln1_b_ref[0])
    q = mm(q_in.astype(jnp.bfloat16), wq_ref) + bq_ref[0]        # (M, D)
    kv = mm(x.astype(jnp.bfloat16), wkv_ref) + bkv_ref[0]        # (M, 2D)

    q3 = q.reshape(bt, seq_len, D)
    kv3 = kv.reshape(bt, seq_len, 2 * D)

    # Stack head slices along the batch axis -> ONE batched einsum pair for all
    # heads instead of a per-head einsum loop.
    qh = jnp.concatenate(
        [q3[:, :, h * dh:(h + 1) * dh] for h in range(num_heads)],
        axis=0).astype(jnp.bfloat16)                              # (H*bt, L, dh)
    kh = jnp.concatenate(
        [kv3[:, :, h * dh:(h + 1) * dh] for h in range(num_heads)],
        axis=0).astype(jnp.bfloat16)
    vh = jnp.concatenate(
        [kv3[:, :, D + h * dh:D + (h + 1) * dh] for h in range(num_heads)],
        axis=0).astype(jnp.bfloat16)

    s = jnp.einsum('bqd,bkd->bqk', qh, kh,
                   preferred_element_type=jnp.float32)            # (H*bt, L, L)
    s = s + amask                                                 # additive causal mask
    s = s - jnp.max(s, axis=-1, keepdims=True)
    p = jnp.exp(s)
    p = p * pl.reciprocal(jnp.sum(p, axis=-1, keepdims=True), approx=True)
    o = jnp.einsum('bqk,bkd->bqd', p.astype(jnp.bfloat16), vh,
                   preferred_element_type=jnp.float32)            # (H*bt, L, dh)

    attn = jnp.concatenate([o[h * bt:(h + 1) * bt] for h in range(num_heads)],
                           axis=-1).reshape(M, D)                 # concat heads
    attn = mm(attn.astype(jnp.bfloat16), wo_ref) + bo_ref[0]      # full-width Wo

    h1 = q_in + attn                          # seqs = Q + mha_outputs

    # --- point-wise feed-forward (Conv1d k=1 == per-token linear) ---
    y = _layernorm(h1, ln2_g_ref[0], ln2_b_ref[0])
    z = jnp.maximum(mm(y.astype(jnp.bfloat16), w1_ref) + b1_ref[0], 0.0)
    z = mm(z.astype(jnp.bfloat16), w2_ref) + b2_ref[0]
    x_new = (z + y) * keep                    # FFN residual, then timeline mask

    x_scr[...] = x_new                        # carry to next layer iteration

    @pl.when(l == n_layers - 1)
    def _():
        out_ref[...] = _layernorm(x_new, lnf_g_ref[0], lnf_b_ref[0])


# ------------------------------- wrapper ------------------------------------ #

def _vmem_capacity_bytes():
    try:
        return int(getattr(pltpu.get_tpu_info(), 'vmem_capacity_bytes', 128 << 20))
    except Exception:
        return 128 << 20


def _pick_batch_tile(B, L, D, vmem_cap):
    """Largest legal batch tile whose VMEM footprint fits a per-generation budget.
    On small-VMEM chips (v7x: 64 MiB/core, 2 TCs) keep >= 2 tiles on the
    "parallel" grid axis so both TensorCores get work."""
    small_vmem = vmem_cap < (100 << 20)
    budget = (24 << 20) if small_vmem else (56 << 20)

    def footprint(bt):
        rows = bt * L
        # resident scratch + double-buffered in/out blocks + keep mask
        return rows * D * 4 * 5 + rows * 8

    legal = [c for c in range(1, B + 1)
             if B % c == 0 and (((c * L) % 8 == 0) or c == B)]
    fitting = [c for c in legal if footprint(c) <= budget]
    bt = max(fitting) if fitting else min(legal)
    if small_vmem and B > 1:
        half = [c for c in legal if c <= B // 2]
        if half:
            bt = min(bt, max(half))
    return bt


def prepare_params(params, opt):
    """One-time per-layer weight stacking, bf16 casting, K|V fusion and
    1/sqrt(dh) scale folding.  Call once; reuse the result for every forward."""
    D = 2 * opt['hidden_units']
    scale = 1.0 / ((D // opt['num_heads']) ** 0.5)
    blocks = params['blocks']

    def stk(name):
        return jnp.stack([b[name] for b in blocks], axis=0)

    return {
        'ln1_g': stk('ln1_g'), 'ln1_b': stk('ln1_b'),
        'wq': (stk('wq') * scale).astype(jnp.bfloat16),
        'bq': stk('bq') * scale,
        'wkv': jnp.concatenate([stk('wk'), stk('wv')], axis=-1).astype(jnp.bfloat16),
        'bkv': jnp.concatenate([stk('bk'), stk('bv')], axis=-1),
        'wo': stk('wo').astype(jnp.bfloat16), 'bo': stk('bo'),
        'ln2_g': stk('ln2_g'), 'ln2_b': stk('ln2_b'),
        'w1': stk('w1').astype(jnp.bfloat16), 'b1': stk('b1'),
        'w2': stk('w2').astype(jnp.bfloat16), 'b2': stk('b2'),
        'ln_f_g': params['ln_f_g'], 'ln_f_b': params['ln_f_b'],
        'pos_emb': params['pos_emb'],
    }


def attention_forward(seqs_data, seqs, position, prep, opt):
    B, L, D = seqs.shape
    H = opt['num_heads']
    nb = opt['num_blocks']

    # Glue math (XLA fuses it with the reshapes): embedding gather, keep mask,
    # positional add + prep masking.  Dropouts are identity (eval mode).
    pos = jnp.take(prep['pos_emb'], position, axis=0)                          # (B, L, D)
    keep = (seqs_data != opt['itemnum'] - 1).astype(jnp.float32)[..., None]    # (B, L, 1)
    x2 = ((seqs + pos) * keep).reshape(B * L, D)
    keep2 = keep.reshape(B * L, 1)

    # Additive causal mask (0 allowed / -1e30 disallowed), resident across grid.
    idx = jnp.arange(L)
    amask = jnp.where(idx[None, :] <= idx[:, None],
                      jnp.float32(0.0), jnp.float32(-1e30))

    vmem_cap = _vmem_capacity_bytes()
    Bt = _pick_batch_tile(B, L, D, vmem_cap)
    rows = Bt * L
    vmem_limit = (32 << 20) if vmem_cap < (100 << 20) else (64 << 20)

    act_spec = pl.BlockSpec((rows, D), lambda b, l: (b, 0))
    keep_spec = pl.BlockSpec((rows, 1), lambda b, l: (b, 0))
    mask_spec = pl.BlockSpec((L, L), lambda b, l: (0, 0))
    wd_spec = pl.BlockSpec((None, D, D), lambda b, l: (l, 0, 0))
    wkv_spec = pl.BlockSpec((None, D, 2 * D), lambda b, l: (l, 0, 0))
    vd_spec = pl.BlockSpec((None, 1, D), lambda b, l: (l, 0, 0))
    vkv_spec = pl.BlockSpec((None, 1, 2 * D), lambda b, l: (l, 0, 0))
    f_spec = pl.BlockSpec((1, D), lambda b, l: (0, 0))

    out2 = pl.pallas_call(
        functools.partial(fused_stack_kernel, num_heads=H, bt=Bt, seq_len=L),
        out_shape=jax.ShapeDtypeStruct((B * L, D), jnp.float32),
        grid=(B // Bt, nb),
        in_specs=[act_spec, keep_spec, mask_spec,
                  vd_spec, vd_spec,            # ln1_g, ln1_b
                  wd_spec, vd_spec,            # wq, bq (scale pre-folded)
                  wkv_spec, vkv_spec,          # wkv, bkv (fused K|V)
                  wd_spec, vd_spec,            # wo, bo
                  vd_spec, vd_spec,            # ln2_g, ln2_b
                  wd_spec, vd_spec,            # w1, b1
                  wd_spec, vd_spec,            # w2, b2
                  f_spec, f_spec],             # ln_f_g, ln_f_b
        out_specs=act_spec,
        scratch_shapes=[pltpu.VMEM((rows, D), jnp.float32)],
        compiler_params=pltpu.CompilerParams(
            dimension_semantics=("parallel", "arbitrary"),
            vmem_limit_bytes=vmem_limit),
    )(x2, keep2, amask,
      prep['ln1_g'], prep['ln1_b'],
      prep['wq'], prep['bq'],
      prep['wkv'], prep['bkv'],
      prep['wo'], prep['bo'],
      prep['ln2_g'], prep['ln2_b'],
      prep['w1'], prep['b1'],
      prep['w2'], prep['b2'],
      prep['ln_f_g'], prep['ln_f_b'])

    return out2.reshape(B, L, D)


# -------------------------- params / reference ------------------------------ #

def init_params(key, opt):
    D = 2 * opt['hidden_units']
    keys = iter(jax.random.split(key, 8 + 16 * opt['num_blocks']))

    def nrm(shape, scale):
        return scale * jax.random.normal(next(keys), shape, dtype=jnp.float32)

    params = {
        'pos_emb': nrm((opt['maxlen'], D), 0.1).at[0].set(0.0),   # padding_idx=0
        'ln_f_g': 1.0 + nrm((1, D), 0.02),
        'ln_f_b': nrm((1, D), 0.02),
        'blocks': [],
    }
    ws = 1.0 / (D ** 0.5)
    for _ in range(opt['num_blocks']):
        params['blocks'].append({
            'ln1_g': 1.0 + nrm((1, D), 0.02), 'ln1_b': nrm((1, D), 0.02),
            'wq': nrm((D, D), ws), 'wk': nrm((D, D), ws), 'wv': nrm((D, D), ws),
            'bq': nrm((1, D), 0.02), 'bk': nrm((1, D), 0.02), 'bv': nrm((1, D), 0.02),
            'wo': nrm((D, D), ws), 'bo': nrm((1, D), 0.02),
            'ln2_g': 1.0 + nrm((1, D), 0.02), 'ln2_b': nrm((1, D), 0.02),
            'w1': nrm((D, D), ws), 'b1': nrm((1, D), 0.02),
            'w2': nrm((D, D), ws), 'b2': nrm((1, D), 0.02),
        })
    return params


def reference_forward(seqs_data, seqs, position, params, opt):
    """Pure-JAX reference mirroring the PyTorch forward (eval mode, f32)."""
    B, L, D = seqs.shape
    H = opt['num_heads']
    dh = D // H
    hp = jax.lax.Precision.HIGHEST

    pos = params['pos_emb'][position]
    keep = (seqs_data != opt['itemnum'] - 1).astype(jnp.float32)[..., None]
    x = (seqs + pos) * keep
    causal = jnp.tril(jnp.ones((L, L), dtype=bool))
    for blk in params['blocks']:
        q_in = _layernorm(x, blk['ln1_g'][0], blk['ln1_b'][0])
        q = jnp.einsum('bld,de->ble', q_in, blk['wq'], precision=hp) + blk['bq'][0]
        k = jnp.einsum('bld,de->ble', x, blk['wk'], precision=hp) + blk['bk'][0]
        v = jnp.einsum('bld,de->ble', x, blk['wv'], precision=hp) + blk['bv'][0]
        qh = q.reshape(B, L, H, dh)
        kh = k.reshape(B, L, H, dh)
        vh = v.reshape(B, L, H, dh)
        s = jnp.einsum('bqhd,bkhd->bhqk', qh, kh, precision=hp) / (dh ** 0.5)
        s = jnp.where(causal[None, None], s, -1e30)
        p = jax.nn.softmax(s, axis=-1)
        o = jnp.einsum('bhqk,bkhd->bqhd', p, vh, precision=hp).reshape(B, L, D)
        o = jnp.einsum('bld,de->ble', o, blk['wo'], precision=hp) + blk['bo'][0]
        h1 = q_in + o
        y = _layernorm(h1, blk['ln2_g'][0], blk['ln2_b'][0])
        z = jnp.maximum(jnp.einsum('bld,de->ble', y, blk['w1'], precision=hp) + blk['b1'][0], 0.0)
        z = jnp.einsum('bld,de->ble', z, blk['w2'], precision=hp) + blk['b2'][0]
        x = (z + y) * keep
    return _layernorm(x, params['ln_f_g'][0], params['ln_f_b'][0])


if __name__ == "__main__":
    opt = {'hidden_units': 16, 'num_heads': 2, 'num_blocks': 2,
           'maxlen': 8, 'itemnum': 10, 'dropout': 0.1, 'cuda': False}
    B, L = 2, opt['maxlen']
    D = 2 * opt['hidden_units']

    key = jax.random.PRNGKey(0)
    k_param, k_seq, k_data, k_pos = jax.random.split(key, 4)
    params = init_params(k_param, opt)
    prep = prepare_params(params, opt)     # one-time stacking / bf16 cast / scale fold

    seqs = 0.5 * jax.random.normal(k_seq, (B, L, D), dtype=jnp.float32)
    seqs_data = jax.random.randint(k_data, (B, L), 0, opt['itemnum'])   # some hit itemnum-1
    position = jax.random.randint(k_pos, (B, L), 0, opt['maxlen'])

    fwd = jax.jit(functools.partial(attention_forward, opt=opt))
    out = jax.block_until_ready(fwd(seqs_data, seqs, position, prep))

    ref = reference_forward(seqs_data, seqs, position, params, opt)
    assert out.shape == (B, L, D)
    max_err = float(jnp.max(jnp.abs(out - ref)))
    assert jnp.allclose(out, ref, rtol=5e-2, atol=5e-2), f"max_err={max_err}"
    print("KERNEL_OK")
</pallas_src>

<mosaic_0001>
module attributes {stable_mosaic.version = 11 : i64} {
  func.func @fused_stack_kernel(%arg0: i32, %arg1: i32, %arg2: memref<16x32xf32, #tpu.memory_space<vmem>>, %arg3: memref<16x1xf32, #tpu.memory_space<vmem>>, %arg4: memref<8x8xf32, #tpu.memory_space<vmem>>, %arg5: memref<1x1x32xf32, #tpu.memory_space<vmem>>, %arg6: memref<1x1x32xf32, #tpu.memory_space<vmem>>, %arg7: memref<1x32x32xbf16, #tpu.memory_space<vmem>>, %arg8: memref<1x1x32xf32, #tpu.memory_space<vmem>>, %arg9: memref<1x32x64xbf16, #tpu.memory_space<vmem>>, %arg10: memref<1x1x64xf32, #tpu.memory_space<vmem>>, %arg11: memref<1x32x32xbf16, #tpu.memory_space<vmem>>, %arg12: memref<1x1x32xf32, #tpu.memory_space<vmem>>, %arg13: memref<1x1x32xf32, #tpu.memory_space<vmem>>, %arg14: memref<1x1x32xf32, #tpu.memory_space<vmem>>, %arg15: memref<1x32x32xbf16, #tpu.memory_space<vmem>>, %arg16: memref<1x1x32xf32, #tpu.memory_space<vmem>>, %arg17: memref<1x32x32xbf16, #tpu.memory_space<vmem>>, %arg18: memref<1x1x32xf32, #tpu.memory_space<vmem>>, %arg19: memref<1x32xf32, #tpu.memory_space<vmem>>, %arg20: memref<1x32xf32, #tpu.memory_space<vmem>>, %arg21: memref<16x32xf32, #tpu.memory_space<vmem>>, %arg22: memref<16x32xf32, #tpu.memory_space<vmem>>) attributes {dimension_semantics = [#tpu.dimension_semantics<parallel>, #tpu.dimension_semantics<arbitrary>], iteration_bounds = array<i64: 1, 2>, scalar_prefetch = 0 : i64, scratch_operands = 1 : i64, tpu.core_type = #tpu.core_type<tc>, window_params = [{transform_indices = @transform_0, window_bounds = array<i64: 16, 32>}, {transform_indices = @transform_1, window_bounds = array<i64: 16, 1>}, {pipeline_mode = #tpu.pipeline_mode<synchronous>, transform_indices = @transform_2, window_bounds = array<i64: 8, 8>}, {transform_indices = @transform_3, window_bounds = array<i64: 1, 1, 32>}, {transform_indices = @transform_4, window_bounds = array<i64: 1, 1, 32>}, {transform_indices = @transform_5, window_bounds = array<i64: 1, 32, 32>}, {transform_indices = @transform_6, window_bounds = array<i64: 1, 1, 32>}, {transform_indices = @transform_7, window_bounds = array<i64: 1, 32, 64>}, {transform_indices = @transform_8, window_bounds = array<i64: 1, 1, 64>}, {transform_indices = @transform_9, window_bounds = array<i64: 1, 32, 32>}, {transform_indices = @transform_10, window_bounds = array<i64: 1, 1, 32>}, {transform_indices = @transform_11, window_bounds = array<i64: 1, 1, 32>}, {transform_indices = @transform_12, window_bounds = array<i64: 1, 1, 32>}, {transform_indices = @transform_13, window_bounds = array<i64: 1, 32, 32>}, {transform_indices = @transform_14, window_bounds = array<i64: 1, 1, 32>}, {transform_indices = @transform_15, window_bounds = array<i64: 1, 32, 32>}, {transform_indices = @transform_16, window_bounds = array<i64: 1, 1, 32>}, {pipeline_mode = #tpu.pipeline_mode<synchronous>, transform_indices = @transform_17, window_bounds = array<i64: 1, 32>}, {pipeline_mode = #tpu.pipeline_mode<synchronous>, transform_indices = @transform_18, window_bounds = array<i64: 1, 32>}, {transform_indices = @transform_19, window_bounds = array<i64: 16, 32>}]} {
    %c0_i32 = arith.constant 0 : i32
    %0 = arith.cmpi eq, %arg1, %c0_i32 : i32
    %1 = arith.extui %0 : i1 to i32
    %c0_i32_0 = arith.constant 0 : i32
    %2 = arith.cmpi ne, %1, %c0_i32_0 : i32
    scf.if %2 {
      %c0_70 = arith.constant 0 : index
      %c0_71 = arith.constant 0 : index
      %151 = vector.load %arg2[%c0_70, %c0_71] : memref<16x32xf32, #tpu.memory_space<vmem>>, vector<16x32xf32>
      %c0_72 = arith.constant 0 : index
      %c0_73 = arith.constant 0 : index
      %152 = vector.load %arg22[%c0_72, %c0_73] : memref<16x32xf32, #tpu.memory_space<vmem>>, vector<16x32xf32>
      tpu.vector_store %arg22[%c0_72, %c0_73], %151 {strides = array<i32>} : memref<16x32xf32, #tpu.memory_space<vmem>>, vector<16x32xf32>,
    } else {
    }
    %c0 = arith.constant 0 : index
    %c0_1 = arith.constant 0 : index
    %3 = vector.load %arg22[%c0, %c0_1] : memref<16x32xf32, #tpu.memory_space<vmem>>, vector<16x32xf32>
    %c0_2 = arith.constant 0 : index
    %c0_3 = arith.constant 0 : index
    %4 = vector.load %arg3[%c0_2, %c0_3] : memref<16x1xf32, #tpu.memory_space<vmem>>, vector<16x1xf32>
    %c0_4 = arith.constant 0 : index
    %c0_5 = arith.constant 0 : index
    %5 = vector.load %arg4[%c0_4, %c0_5] : memref<8x8xf32, #tpu.memory_space<vmem>>, vector<8x8xf32>
    %c0_6 = arith.constant 0 : index
    %c0_7 = arith.constant 0 : index
    %c0_8 = arith.constant 0 : index
    %6 = vector.load %arg5[%c0_6, %c0_7, %c0_8] : memref<1x1x32xf32, #tpu.memory_space<vmem>>, vector<1x1x32xf32>
    %7 = vector.shape_cast %6 : vector<1x1x32xf32> to vector<32xf32>
    %c0_9 = arith.constant 0 : index
    %c0_10 = arith.constant 0 : index
    %c0_11 = arith.constant 0 : index
    %8 = vector.load %arg6[%c0_9, %c0_10, %c0_11] : memref<1x1x32xf32, #tpu.memory_space<vmem>>, vector<1x1x32xf32>
    %9 = vector.shape_cast %8 : vector<1x1x32xf32> to vector<32xf32>
    %cst = arith.constant dense<0.000000e+00> : vector<16xf32>
    %10 = vector.multi_reduction <add>, %3, %cst [1] : vector<16x32xf32> to vector<16xf32>
    %11 = vector.shape_cast %10 : vector<16xf32> to vector<16x1xf32>
    %cst_12 = arith.constant 3.200000e+01 : f32
    %12 = vector.broadcast %cst_12 : f32 to vector<16x1xf32>
    %13 = arith.divf %11, %12 : vector<16x1xf32>
    %14 = vector.broadcast %13 : vector<16x1xf32> to vector<16x32xf32>
    %15 = arith.subf %3, %14 : vector<16x32xf32>
    %16 = arith.mulf %15, %15 : vector<16x32xf32>
    %cst_13 = arith.constant dense<0.000000e+00> : vector<16xf32>
    %17 = vector.multi_reduction <add>, %16, %cst_13 [1] : vector<16x32xf32> to vector<16xf32>
    %18 = vector.shape_cast %17 : vector<16xf32> to vector<16x1xf32>
    %cst_14 = arith.constant 3.200000e+01 : f32
    %19 = vector.broadcast %cst_14 : f32 to vector<16x1xf32>
    %20 = arith.divf %18, %19 : vector<16x1xf32>
    %21 = vector.broadcast %13 : vector<16x1xf32> to vector<16x32xf32>
    %22 = arith.subf %3, %21 : vector<16x32xf32>
    %cst_15 = arith.constant 9.99999993E-9 : f32
    %23 = vector.broadcast %cst_15 : f32 to vector<16x1xf32>
    %24 = arith.addf %20, %23 : vector<16x1xf32>
    %25 = math.rsqrt %24 : vector<16x1xf32>
    %26 = vector.broadcast %25 : vector<16x1xf32> to vector<16x32xf32>
    %27 = arith.mulf %22, %26 : vector<16x32xf32>
    %28 = vector.shape_cast %7 : vector<32xf32> to vector<1x32xf32>
    %29 = vector.broadcast %28 : vector<1x32xf32> to vector<16x32xf32>
    %30 = arith.mulf %27, %29 : vector<16x32xf32>
    %31 = vector.shape_cast %9 : vector<32xf32> to vector<1x32xf32>
    %32 = vector.broadcast %31 : vector<1x32xf32> to vector<16x32xf32>
    %33 = arith.addf %30, %32 : vector<16x32xf32>
    %34 = arith.truncf %33 : vector<16x32xf32> to vector<16x32xbf16>
    %c0_16 = arith.constant 0 : index
    %c0_17 = arith.constant 0 : index
    %c0_18 = arith.constant 0 : index
    %35 = vector.load %arg7[%c0_16, %c0_17, %c0_18] : memref<1x32x32xbf16, #tpu.memory_space<vmem>>, vector<1x32x32xbf16>
    %36 = vector.shape_cast %35 : vector<1x32x32xbf16> to vector<32x32xbf16>
    %cst_19 = arith.constant dense<0.000000e+00> : vector<16x32xf32>
    %37 = tpu.matmul %34, %36, %cst_19 {dimension_numbers = #tpu.dot_dimension_numbers<[1], [0], [0], [1], [0, 0, 1, 1], [], []>} : vector<16x32xbf16>, vector<32x32xbf16>, vector<16x32xf32> -> vector<16x32xf32>
    %c0_20 = arith.constant 0 : index
    %c0_21 = arith.constant 0 : index
    %c0_22 = arith.constant 0 : index
    %38 = vector.load %arg8[%c0_20, %c0_21, %c0_22] : memref<1x1x32xf32, #tpu.memory_space<vmem>>, vector<1x1x32xf32>
    %39 = vector.shape_cast %38 : vector<1x1x32xf32> to vector<32xf32>
    %40 = vector.shape_cast %39 : vector<32xf32> to vector<1x32xf32>
    %41 = vector.broadcast %40 : vector<1x32xf32> to vector<16x32xf32>
    %42 = arith.addf %37, %41 : vector<16x32xf32>
    %43 = arith.truncf %3 : vector<16x32xf32> to vector<16x32xbf16>
    %c0_23 = arith.constant 0 : index
    %c0_24 = arith.constant 0 : index
    %c0_25 = arith.constant 0 : index
    %44 = vector.load %arg9[%c0_23, %c0_24, %c0_25] : memref<1x32x64xbf16, #tpu.memory_space<vmem>>, vector<1x32x64xbf16>
    %45 = vector.shape_cast %44 : vector<1x32x64xbf16> to vector<32x64xbf16>
    %cst_26 = arith.constant dense<0.000000e+00> : vector<16x64xf32>
    %46 = tpu.matmul %43, %45, %cst_26 {dimension_numbers = #tpu.dot_dimension_numbers<[1], [0], [0], [1], [0, 0, 1, 1], [], []>} : vector<16x32xbf16>, vector<32x64xbf16>, vector<16x64xf32> -> vector<16x64xf32>
    %c0_27 = arith.constant 0 : index
    %c0_28 = arith.constant 0 : index
    %c0_29 = arith.constant 0 : index
    %47 = vector.load %arg10[%c0_27, %c0_28, %c0_29] : memref<1x1x64xf32, #tpu.memory_space<vmem>>, vector<1x1x64xf32>
    %48 = vector.shape_cast %47 : vector<1x1x64xf32> to vector<64xf32>
    %49 = vector.shape_cast %48 : vector<64xf32> to vector<1x64xf32>
    %50 = vector.broadcast %49 : vector<1x64xf32> to vector<16x64xf32>
    %51 = arith.addf %46, %50 : vector<16x64xf32>
    %52 = vector.shape_cast %42 : vector<16x32xf32> to vector<2x8x32xf32>
    %53 = vector.shape_cast %51 : vector<16x64xf32> to vector<2x8x64xf32>
    %54 = vector.extract_strided_slice %52 {offsets = [0, 0, 0], sizes = [2, 8, 16], strides = [1, 1, 1]} : vector<2x8x32xf32> to vector<2x8x16xf32>
    %55 = vector.extract_strided_slice %52 {offsets = [0, 0, 16], sizes = [2, 8, 16], strides = [1, 1, 1]} : vector<2x8x32xf32> to vector<2x8x16xf32>
    %56 = tpu.concatenate %54, %55 in 0 : vector<2x8x16xf32>, vector<2x8x16xf32> -> vector<4x8x16xf32>
    %57 = arith.truncf %56 : vector<4x8x16xf32> to vector<4x8x16xbf16>
    %58 = vector.extract_strided_slice %53 {offsets = [0, 0, 0], sizes = [2, 8, 16], strides = [1, 1, 1]} : vector<2x8x64xf32> to vector<2x8x16xf32>
    %59 = vector.extract_strided_slice %53 {offsets = [0, 0, 16], sizes = [2, 8, 16], strides = [1, 1, 1]} : vector<2x8x64xf32> to vector<2x8x16xf32>
    %60 = tpu.concatenate %58, %59 in 0 : vector<2x8x16xf32>, vector<2x8x16xf32> -> vector<4x8x16xf32>
    %61 = arith.truncf %60 : vector<4x8x16xf32> to vector<4x8x16xbf16>
    %62 = vector.extract_strided_slice %53 {offsets = [0, 0, 32], sizes = [2, 8, 16], strides = [1, 1, 1]} : vector<2x8x64xf32> to vector<2x8x16xf32>
    %63 = vector.extract_strided_slice %53 {offsets = [0, 0, 48], sizes = [2, 8, 16], strides = [1, 1, 1]} : vector<2x8x64xf32> to vector<2x8x16xf32>
    %64 = tpu.concatenate %62, %63 in 0 : vector<2x8x16xf32>, vector<2x8x16xf32> -> vector<4x8x16xf32>
    %65 = arith.truncf %64 : vector<4x8x16xf32> to vector<4x8x16xbf16>
    "tpu.trace_start"() <{level = 10 : i32, message = "bqd,bkd->bqk"}> : () -> ()
    %cst_30 = arith.constant dense<0.000000e+00> : vector<4x8x8xf32>
    %66 = tpu.matmul %57, %61, %cst_30 {dimension_numbers = #tpu.dot_dimension_numbers<[2], [2], [1], [1], [0, 0, 0, 1, 1, 1], [0], [0]>} : vector<4x8x16xbf16>, vector<4x8x16xbf16>, vector<4x8x8xf32> -> vector<4x8x8xf32>
    "tpu.trace_stop"() : () -> ()
    %67 = vector.shape_cast %5 : vector<8x8xf32> to vector<1x8x8xf32>
    %68 = vector.broadcast %67 : vector<1x8x8xf32> to vector<4x8x8xf32>
    %69 = arith.addf %66, %68 : vector<4x8x8xf32>
    %cst_31 = arith.constant dense<0xFF800000> : vector<4x8xf32>
    %70 = vector.multi_reduction <maximumf>, %69, %cst_31 [2] : vector<4x8x8xf32> to vector<4x8xf32>
    %71 = vector.shape_cast %70 : vector<4x8xf32> to vector<4x8x1xf32>
    %72 = vector.broadcast %71 : vector<4x8x1xf32> to vector<4x8x8xf32>
    %73 = arith.subf %69, %72 : vector<4x8x8xf32>
    %74 = math.exp %73 : vector<4x8x8xf32>
    %cst_32 = arith.constant dense<0.000000e+00> : vector<4x8xf32>
    %75 = vector.multi_reduction <add>, %74, %cst_32 [2] : vector<4x8x8xf32> to vector<4x8xf32>
    %76 = vector.shape_cast %75 : vector<4x8xf32> to vector<4x8x1xf32>
    %77 = tpu.reciprocal %76 {approx = true} : vector<4x8x1xf32> -> vector<4x8x1xf32>
    %78 = vector.broadcast %77 : vector<4x8x1xf32> to vector<4x8x8xf32>
    %79 = arith.mulf %74, %78 : vector<4x8x8xf32>
    %80 = arith.truncf %79 : vector<4x8x8xf32> to vector<4x8x8xbf16>
    "tpu.trace_start"() <{level = 10 : i32, message = "bqk,bkd->bqd"}> : () -> ()
    %cst_33 = arith.constant dense<0.000000e+00> : vector<4x8x16xf32>
    %81 = tpu.matmul %80, %65, %cst_33 {dimension_numbers = #tpu.dot_dimension_numbers<[2], [1], [1], [2], [0, 0, 0, 1, 1, 2], [0], [0]>} : vector<4x8x8xbf16>, vector<4x8x16xbf16>, vector<4x8x16xf32> -> vector<4x8x16xf32>
    "tpu.trace_stop"() : () -> ()
    %82 = vector.extract_strided_slice %81 {offsets = [0, 0, 0], sizes = [2, 8, 16], strides = [1, 1, 1]} : vector<4x8x16xf32> to vector<2x8x16xf32>
    %83 = vector.extract_strided_slice %81 {offsets = [2, 0, 0], sizes = [2, 8, 16], strides = [1, 1, 1]} : vector<4x8x16xf32> to vector<2x8x16xf32>
    %84 = tpu.concatenate %82, %83 in 2 : vector<2x8x16xf32>, vector<2x8x16xf32> -> vector<2x8x32xf32>
    %85 = vector.shape_cast %84 : vector<2x8x32xf32> to vector<16x32xf32>
    %86 = arith.truncf %85 : vector<16x32xf32> to vector<16x32xbf16>
    %c0_34 = arith.constant 0 : index
    %c0_35 = arith.constant 0 : index
    %c0_36 = arith.constant 0 : index
    %87 = vector.load %arg11[%c0_34, %c0_35, %c0_36] : memref<1x32x32xbf16, #tpu.memory_space<vmem>>, vector<1x32x32xbf16>
    %88 = vector.shape_cast %87 : vector<1x32x32xbf16> to vector<32x32xbf16>
    %cst_37 = arith.constant dense<0.000000e+00> : vector<16x32xf32>
    %89 = tpu.matmul %86, %88, %cst_37 {dimension_numbers = #tpu.dot_dimension_numbers<[1], [0], [0], [1], [0, 0, 1, 1], [], []>} : vector<16x32xbf16>, vector<32x32xbf16>, vector<16x32xf32> -> vector<16x32xf32>
    %c0_38 = arith.constant 0 : index
    %c0_39 = arith.constant 0 : index
    %c0_40 = arith.constant 0 : index
    %90 = vector.load %arg12[%c0_38, %c0_39, %c0_40] : memref<1x1x32xf32, #tpu.memory_space<vmem>>, vector<1x1x32xf32>
    %91 = vector.shape_cast %90 : vector<1x1x32xf32> to vector<32xf32>
    %92 = vector.shape_cast %91 : vector<32xf32> to vector<1x32xf32>
    %93 = vector.broadcast %92 : vector<1x32xf32> to vector<16x32xf32>
    %94 = arith.addf %89, %93 : vector<16x32xf32>
    %95 = arith.addf %33, %94 : vector<16x32xf32>
    %c0_41 = arith.constant 0 : index
    %c0_42 = arith.constant 0 : index
    %c0_43 = arith.constant 0 : index
    %96 = vector.load %arg13[%c0_41, %c0_42, %c0_43] : memref<1x1x32xf32, #tpu.memory_space<vmem>>, vector<1x1x32xf32>
    %97 = vector.shape_cast %96 : vector<1x1x32xf32> to vector<32xf32>
    %c0_44 = arith.constant 0 : index
    %c0_45 = arith.constant 0 : index
    %c0_46 = arith.constant 0 : index
    %98 = vector.load %arg14[%c0_44, %c0_45, %c0_46] : memref<1x1x32xf32, #tpu.memory_space<vmem>>, vector<1x1x32xf32>
    %99 = vector.shape_cast %98 : vector<1x1x32xf32> to vector<32xf32>
    %cst_47 = arith.constant dense<0.000000e+00> : vector<16xf32>
    %100 = vector.multi_reduction <add>, %95, %cst_47 [1] : vector<16x32xf32> to vector<16xf32>
    %101 = vector.shape_cast %100 : vector<16xf32> to vector<16x1xf32>
    %cst_48 = arith.constant 3.200000e+01 : f32
    %102 = vector.broadcast %cst_48 : f32 to vector<16x1xf32>
    %103 = arith.divf %101, %102 : vector<16x1xf32>
    %104 = vector.broadcast %103 : vector<16x1xf32> to vector<16x32xf32>
    %105 = arith.subf %95, %104 : vector<16x32xf32>
    %106 = arith.mulf %105, %105 : vector<16x32xf32>
    %cst_49 = arith.constant dense<0.000000e+00> : vector<16xf32>
    %107 = vector.multi_reduction <add>, %106, %cst_49 [1] : vector<16x32xf32> to vector<16xf32>
    %108 = vector.shape_cast %107 : vector<16xf32> to vector<16x1xf32>
    %cst_50 = arith.constant 3.200000e+01 : f32
    %109 = vector.broadcast %cst_50 : f32 to vector<16x1xf32>
    %110 = arith.divf %108, %109 : vector<16x1xf32>
    %111 = vector.broadcast %103 : vector<16x1xf32> to vector<16x32xf32>
    %112 = arith.subf %95, %111 : vector<16x32xf32>
    %cst_51 = arith.constant 9.99999993E-9 : f32
    %113 = vector.broadcast %cst_51 : f32 to vector<16x1xf32>
    %114 = arith.addf %110, %113 : vector<16x1xf32>
    %115 = math.rsqrt %114 : vector<16x1xf32>
    %116 = vector.broadcast %115 : vector<16x1xf32> to vector<16x32xf32>
    %117 = arith.mulf %112, %116 : vector<16x32xf32>
    %118 = vector.shape_cast %97 : vector<32xf32> to vector<1x32xf32>
    %119 = vector.broadcast %118 : vector<1x32xf32> to vector<16x32xf32>
    %120 = arith.mulf %117, %119 : vector<16x32xf32>
    %121 = vector.shape_cast %99 : vector<32xf32> to vector<1x32xf32>
    %122 = vector.broadcast %121 : vector<1x32xf32> to vector<16x32xf32>
    %123 = arith.addf %120, %122 : vector<16x32xf32>
    %124 = arith.truncf %123 : vector<16x32xf32> to vector<16x32xbf16>
    %c0_52 = arith.constant 0 : index
    %c0_53 = arith.constant 0 : index
    %c0_54 = arith.constant 0 : index
    %125 = vector.load %arg15[%c0_52, %c0_53, %c0_54] : memref<1x32x32xbf16, #tpu.memory_space<vmem>>, vector<1x32x32xbf16>
    %126 = vector.shape_cast %125 : vector<1x32x32xbf16> to vector<32x32xbf16>
    %cst_55 = arith.constant dense<0.000000e+00> : vector<16x32xf32>
    %127 = tpu.matmul %124, %126, %cst_55 {dimension_numbers = #tpu.dot_dimension_numbers<[1], [0], [0], [1], [0, 0, 1, 1], [], []>} : vector<16x32xbf16>, vector<32x32xbf16>, vector<16x32xf32> -> vector<16x32xf32>
    %c0_56 = arith.constant 0 : index
    %c0_57 = arith.constant 0 : index
    %c0_58 = arith.constant 0 : index
    %128 = vector.load %arg16[%c0_56, %c0_57, %c0_58] : memref<1x1x32xf32, #tpu.memory_space<vmem>>, vector<1x1x32xf32>
    %129 = vector.shape_cast %128 : vector<1x1x32xf32> to vector<32xf32>
    %130 = vector.shape_cast %129 : vector<32xf32> to vector<1x32xf32>
    %131 = vector.broadcast %130 : vector<1x32xf32> to vector<16x32xf32>
    %132 = arith.addf %127, %131 : vector<16x32xf32>
    %cst_59 = arith.constant 0.000000e+00 : f32
    %133 = vector.broadcast %cst_59 : f32 to vector<16x32xf32>
    %134 = arith.maximumf %132, %133 : vector<16x32xf32>
    %135 = arith.truncf %134 : vector<16x32xf32> to vector<16x32xbf16>
    %c0_60 = arith.constant 0 : index
    %c0_61 = arith.constant 0 : index
    %c0_62 = arith.constant 0 : index
    %136 = vector.load %arg17[%c0_60, %c0_61, %c0_62] : memref<1x32x32xbf16, #tpu.memory_space<vmem>>, vector<1x32x32xbf16>
    %137 = vector.shape_cast %136 : vector<1x32x32xbf16> to vector<32x32xbf16>
    %cst_63 = arith.constant dense<0.000000e+00> : vector<16x32xf32>
    %138 = tpu.matmul %135, %137, %cst_63 {dimension_numbers = #tpu.dot_dimension_numbers<[1], [0], [0], [1], [0, 0, 1, 1], [], []>} : vector<16x32xbf16>, vector<32x32xbf16>, vector<16x32xf32> -> vector<16x32xf32>
    %c0_64 = arith.constant 0 : index
    %c0_65 = arith.constant 0 : index
    %c0_66 = arith.constant 0 : index
    %139 = vector.load %arg18[%c0_64, %c0_65, %c0_66] : memref<1x1x32xf32, #tpu.memory_space<vmem>>, vector<1x1x32xf32>
    %140 = vector.shape_cast %139 : vector<1x1x32xf32> to vector<32xf32>
    %141 = vector.shape_cast %140 : vector<32xf32> to vector<1x32xf32>
    %142 = vector.broadcast %141 : vector<1x32xf32> to vector<16x32xf32>
    %143 = arith.addf %138, %142 : vector<16x32xf32>
    %144 = arith.addf %143, %123 : vector<16x32xf32>
    %145 = vector.broadcast %4 : vector<16x1xf32> to vector<16x32xf32>
    %146 = arith.mulf %144, %145 : vector<16x32xf32>
    %c0_67 = arith.constant 0 : index
    %c0_68 = arith.constant 0 : index
    %147 = vector.load %arg22[%c0_67, %c0_68] : memref<16x32xf32, #tpu.memory_space<vmem>>, vector<16x32xf32>
    tpu.vector_store %arg22[%c0_67, %c0_68], %146 {strides = array<i32>} : memref<16x32xf32, #tpu.memory_space<vmem>>, vector<16x32xf32>,
    %c1_i32 = arith.constant 1 : i32
    %148 = arith.cmpi eq, %arg1, %c1_i32 : i32
    %149 = arith.extui %148 : i1 to i32
    %c0_i32_69 = arith.constant 0 : i32
    %150 = arith.cmpi ne, %149, %c0_i32_69 : i32
    scf.if %150 {
      %c0_70 = arith.constant 0 : index
      %c0_71 = arith.constant 0 : index
      %151 = vector.load %arg19[%c0_70, %c0_71] : memref<1x32xf32, #tpu.memory_space<vmem>>, vector<1x32xf32>
      %152 = vector.shape_cast %151 : vector<1x32xf32> to vector<32xf32>
      %c0_72 = arith.constant 0 : index
      %c0_73 = arith.constant 0 : index
      %153 = vector.load %arg20[%c0_72, %c0_73] : memref<1x32xf32, #tpu.memory_space<vmem>>, vector<1x32xf32>
      %154 = vector.shape_cast %153 : vector<1x32xf32> to vector<32xf32>
      %cst_74 = arith.constant dense<0.000000e+00> : vector<16xf32>
      %155 = vector.multi_reduction <add>, %146, %cst_74 [1] : vector<16x32xf32> to vector<16xf32>
      %156 = vector.shape_cast %155 : vector<16xf32> to vector<16x1xf32>
      %cst_75 = arith.constant 3.200000e+01 : f32
      %157 = vector.broadcast %cst_75 : f32 to vector<16x1xf32>
      %158 = arith.divf %156, %157 : vector<16x1xf32>
      %159 = vector.broadcast %158 : vector<16x1xf32> to vector<16x32xf32>
      %160 = arith.subf %146, %159 : vector<16x32xf32>
      %161 = arith.mulf %160, %160 : vector<16x32xf32>
      %cst_76 = arith.constant dense<0.000000e+00> : vector<16xf32>
      %162 = vector.multi_reduction <add>, %161, %cst_76 [1] : vector<16x32xf32> to vector<16xf32>
      %163 = vector.shape_cast %162 : vector<16xf32> to vector<16x1xf32>
      %cst_77 = arith.constant 3.200000e+01 : f32
      %164 = vector.broadcast %cst_77 : f32 to vector<16x1xf32>
      %165 = arith.divf %163, %164 : vector<16x1xf32>
      %166 = vector.broadcast %158 : vector<16x1xf32> to vector<16x32xf32>
      %167 = arith.subf %146, %166 : vector<16x32xf32>
      %cst_78 = arith.constant 9.99999993E-9 : f32
      %168 = vector.broadcast %cst_78 : f32 to vector<16x1xf32>
      %169 = arith.addf %165, %168 : vector<16x1xf32>
      %170 = math.rsqrt %169 : vector<16x1xf32>
      %171 = vector.broadcast %170 : vector<16x1xf32> to vector<16x32xf32>
      %172 = arith.mulf %167, %171 : vector<16x32xf32>
      %173 = vector.shape_cast %152 : vector<32xf32> to vector<1x32xf32>
      %174 = vector.broadcast %173 : vector<1x32xf32> to vector<16x32xf32>
      %175 = arith.mulf %172, %174 : vector<16x32xf32>
      %176 = vector.shape_cast %154 : vector<32xf32> to vector<1x32xf32>
      %177 = vector.broadcast %176 : vector<1x32xf32> to vector<16x32xf32>
      %178 = arith.addf %175, %177 : vector<16x32xf32>
      %c0_79 = arith.constant 0 : index
      %c0_80 = arith.constant 0 : index
      %179 = vector.load %arg21[%c0_79, %c0_80] : memref<16x32xf32, #tpu.memory_space<vmem>>, vector<16x32xf32>
      tpu.vector_store %arg21[%c0_79, %c0_80], %178 {strides = array<i32>} : memref<16x32xf32, #tpu.memory_space<vmem>>, vector<16x32xf32>,
    } else {
    }
    return
  }
  func.func @transform_0(%arg0: i32, %arg1: i32) -> (i32, i32) {
    %c0_i32 = arith.constant 0 : i32
    %c0_i32_0 = arith.constant 0 : i32
    return %arg0, %c0_i32 : i32, i32
  }
  func.func @transform_1(%arg0: i32, %arg1: i32) -> (i32, i32) {
    %c0_i32 = arith.constant 0 : i32
    %c0_i32_0 = arith.constant 0 : i32
    return %arg0, %c0_i32 : i32, i32
  }
  func.func @transform_2(%arg0: i32, %arg1: i32) -> (i32, i32) {
    %c0_i32 = arith.constant 0 : i32
    %c0_i32_0 = arith.constant 0 : i32
    %c0_i32_1 = arith.constant 0 : i32
    return %c0_i32, %c0_i32_0 : i32, i32
  }
  func.func @transform_3(%arg0: i32, %arg1: i32) -> (i32, i32, i32) {
    %c0_i32 = arith.constant 0 : i32
    %c0_i32_0 = arith.constant 0 : i32
    %c0_i32_1 = arith.constant 0 : i32
    return %arg1, %c0_i32, %c0_i32_0 : i32, i32, i32
  }
  func.func @transform_4(%arg0: i32, %arg1: i32) -> (i32, i32, i32) {
    %c0_i32 = arith.constant 0 : i32
    %c0_i32_0 = arith.constant 0 : i32
    %c0_i32_1 = arith.constant 0 : i32
    return %arg1, %c0_i32, %c0_i32_0 : i32, i32, i32
  }
  func.func @transform_5(%arg0: i32, %arg1: i32) -> (i32, i32, i32) {
    %c0_i32 = arith.constant 0 : i32
    %c0_i32_0 = arith.constant 0 : i32
    %c0_i32_1 = arith.constant 0 : i32
    return %arg1, %c0_i32, %c0_i32_0 : i32, i32, i32
  }
  func.func @transform_6(%arg0: i32, %arg1: i32) -> (i32, i32, i32) {
    %c0_i32 = arith.constant 0 : i32
    %c0_i32_0 = arith.constant 0 : i32
    %c0_i32_1 = arith.constant 0 : i32
    return %arg1, %c0_i32, %c0_i32_0 : i32, i32, i32
  }
  func.func @transform_7(%arg0: i32, %arg1: i32) -> (i32, i32, i32) {
    %c0_i32 = arith.constant 0 : i32
    %c0_i32_0 = arith.constant 0 : i32
    %c0_i32_1 = arith.constant 0 : i32
    return %arg1, %c0_i32, %c0_i32_0 : i32, i32, i32
  }
  func.func @transform_8(%arg0: i32, %arg1: i32) -> (i32, i32, i32) {
    %c0_i32 = arith.constant 0 : i32
    %c0_i32_0 = arith.constant 0 : i32
    %c0_i32_1 = arith.constant 0 : i32
    return %arg1, %c0_i32, %c0_i32_0 : i32, i32, i32
  }
  func.func @transform_9(%arg0: i32, %arg1: i32) -> (i32, i32, i32) {
    %c0_i32 = arith.constant 0 : i32
    %c0_i32_0 = arith.constant 0 : i32
    %c0_i32_1 = arith.constant 0 : i32
    return %arg1, %c0_i32, %c0_i32_0 : i32, i32, i32
  }
  func.func @transform_10(%arg0: i32, %arg1: i32) -> (i32, i32, i32) {
    %c0_i32 = arith.constant 0 : i32
    %c0_i32_0 = arith.constant 0 : i32
    %c0_i32_1 = arith.constant 0 : i32
    return %arg1, %c0_i32, %c0_i32_0 : i32, i32, i32
  }
  func.func @transform_11(%arg0: i32, %arg1: i32) -> (i32, i32, i32) {
    %c0_i32 = arith.constant 0 : i32
    %c0_i32_0 = arith.constant 0 : i32
    %c0_i32_1 = arith.constant 0 : i32
    return %arg1, %c0_i32, %c0_i32_0 : i32, i32, i32
  }
  func.func @transform_12(%arg0: i32, %arg1: i32) -> (i32, i32, i32) {
    %c0_i32 = arith.constant 0 : i32
    %c0_i32_0 = arith.constant 0 : i32
    %c0_i32_1 = arith.constant 0 : i32
    return %arg1, %c0_i32, %c0_i32_0 : i32, i32, i32
  }
  func.func @transform_13(%arg0: i32, %arg1: i32) -> (i32, i32, i32) {
    %c0_i32 = arith.constant 0 : i32
    %c0_i32_0 = arith.constant 0 : i32
    %c0_i32_1 = arith.constant 0 : i32
    return %arg1, %c0_i32, %c0_i32_0 : i32, i32, i32
  }
  func.func @transform_14(%arg0: i32, %arg1: i32) -> (i32, i32, i32) {
    %c0_i32 = arith.constant 0 : i32
    %c0_i32_0 = arith.constant 0 : i32
    %c0_i32_1 = arith.constant 0 : i32
    return %arg1, %c0_i32, %c0_i32_0 : i32, i32, i32
  }
  func.func @transform_15(%arg0: i32, %arg1: i32) -> (i32, i32, i32) {
    %c0_i32 = arith.constant 0 : i32
    %c0_i32_0 = arith.constant 0 : i32
    %c0_i32_1 = arith.constant 0 : i32
    return %arg1, %c0_i32, %c0_i32_0 : i32, i32, i32
  }
  func.func @transform_16(%arg0: i32, %arg1: i32) -> (i32, i32, i32) {
    %c0_i32 = arith.constant 0 : i32
    %c0_i32_0 = arith.constant 0 : i32
    %c0_i32_1 = arith.constant 0 : i32
    return %arg1, %c0_i32, %c0_i32_0 : i32, i32, i32
  }
  func.func @transform_17(%arg0: i32, %arg1: i32) -> (i32, i32) {
    %c0_i32 = arith.constant 0 : i32
    %c0_i32_0 = arith.constant 0 : i32
    %c0_i32_1 = arith.constant 0 : i32
    return %c0_i32, %c0_i32_0 : i32, i32
  }
  func.func @transform_18(%arg0: i32, %arg1: i32) -> (i32, i32) {
    %c0_i32 = arith.constant 0 : i32
    %c0_i32_0 = arith.constant 0 : i32
    %c0_i32_1 = arith.constant 0 : i32
    return %c0_i32, %c0_i32_0 : i32, i32
  }
  func.func @transform_19(%arg0: i32, %arg1: i32) -> (i32, i32) {
    %c0_i32 = arith.constant 0 : i32
    %c0_i32_0 = arith.constant 0 : i32
    return %arg0, %c0_i32 : i32, i32
  }
}

</mosaic_0001>

<bundles_post_ra>
// kernel: attention_forward.1
= control target key start
LH: loop header
LB: loop body
LE: loop exit
PB: predicated region body
PF: predicated region fallthrough
CT: control target
= control target key end

     0   :  { %s4584_s0 = inlined_call_operand.hbm [shape: f32[16,32], index: 0, kind: input, shape index: {}]   ;;  %s4585_s1 = inlined_call_operand.hbm [shape: f32[16,1], index: 1, kind: input, shape index: {}]   ;;  %s4586_s2 = inlined_call_operand.hbm [shape: f32[8,8], index: 2, kind: input, shape index: {}]   ;;  %s4587_s3 = inlined_call_operand.hbm [shape: f32[2,1,32], index: 3, kind: input, shape index: {}]   ;;  %s4588_s4 = inlined_call_operand.hbm [shape: f32[2,1,32], index: 4, kind: input, shape index: {}]   ;;  %s4589_s5 = inlined_call_operand.hbm [shape: bf16[2,32,32], index: 5, kind: input, shape index: {}]   ;;  %s4590_s6 = inlined_call_operand.hbm [shape: f32[2,1,32], index: 6, kind: input, shape index: {}]   ;;  %s4591_s7 = inlined_call_operand.hbm [shape: bf16[2,32,64], index: 7, kind: input, shape index: {}]   ;;  %s4592_s8 = inlined_call_operand.hbm [shape: f32[2,1,64], index: 8, kind: input, shape index: {}]   ;;  %s4593_s9 = inlined_call_operand.hbm [shape: bf16[2,32,32], index: 9, kind: input, shape index: {}]   ;;  %s4594_s10 = inlined_call_operand.hbm [shape: f32[2,1,32], index: 10, kind: input, shape index: {}]   ;;  %s4595_s11 = inlined_call_operand.hbm [shape: f32[2,1,32], index: 11, kind: input, shape index: {}]   ;;  %s4596_s12 = inlined_call_operand.hbm [shape: f32[2,1,32], index: 12, kind: input, shape index: {}]   ;;  %s4597_s13 = inlined_call_operand.hbm [shape: bf16[2,32,32], index: 13, kind: input, shape index: {}]   ;;  %s4598_s14 = inlined_call_operand.hbm [shape: f32[2,1,32], index: 14, kind: input, shape index: {}]   ;;  %s4599_s15 = inlined_call_operand.hbm [shape: bf16[2,32,32], index: 15, kind: input, shape index: {}]   ;;  %s4600_s16 = inlined_call_operand.hbm [shape: f32[2,1,32], index: 16, kind: input, shape index: {}]   ;;  %s4601_s17 = inlined_call_operand.hbm [shape: f32[1,32], index: 17, kind: input, shape index: {}]   ;;  %s4602_s18 = inlined_call_operand.hbm [shape: f32[1,32], index: 18, kind: input, shape index: {}]   ;;  %s4603_s19 = inlined_call_operand.hbm [shape: f32[16,32], index: 19, kind: output, shape index: {}]  }
   0x1   :  { %4640 = sst [smem:[#allocation52_spill]] %s4584_s0 }
   0x2   :  { %4641 = sst [smem:[#allocation53_spill]] %s4585_s1 }
   0x3   :  { %4642 = sst [smem:[#allocation54_spill]] %s4586_s2 }
   0x4   :  { %4643 = sst [smem:[#allocation55_spill]] %s4587_s3 }
   0x5   :  { %4644 = sst [smem:[#allocation56_spill]] %s4588_s4 }
   0x6   :  { %4645 = sst [smem:[#allocation57_spill]] %s4589_s5 }
   0x7   :  { %4646 = sst [smem:[#allocation58_spill]] %s4590_s6 }
   0x8   :  { %4647 = sst [smem:[#allocation59_spill]] %s4591_s7 }
   0x9   :  { %4648 = sst [smem:[#allocation60_spill]] %s4592_s8 }
   0xa   :  { %4649 = sst [smem:[#allocation61_spill]] %s4593_s9 }
   0xb   :  { %4650 = sst [smem:[#allocation62_spill]] %s4594_s10 }
   0xc   :  { %4651 = sst [smem:[#allocation63_spill]] %s4595_s11 }
   0xd   :  { %4652 = sst [smem:[#allocation64_spill]] %s4596_s12 }
   0xe   :  { %4653 = sst [smem:[#allocation65_spill]] %s4598_s14 }
   0xf   :  { %4654 = sst [smem:[#allocation66_spill]] %s4600_s16 }
  0x10   :  { %4655 = sst [smem:[#allocation67_spill]] %s4601_s17 }
  0x11   :  { %4656 = sst [smem:[#allocation68_spill]] %s4603_s19 }
  0x12   :  { %24 = vsyncpa [#allocation4], 0 }
  0x13   :  { %25 = vsyncpa [#allocation7], 0 }
  0x14   :  { %26 = vsyncpa [#allocation10], 0 }
  0x15   :  { %28 = vsyncpa [#allocation10 + $0x1], 0 }
  0x16   :  { %29 = vsyncpa [#allocation13], 0 }
  0x17   :  { %31 = vsyncpa [#allocation13 + $0x1], 0 }
  0x18   :  { %32 = vsyncpa [#allocation16], 0 }
  0x19   :  { %34 = vsyncpa [#allocation16 + $0x1], 0 }
  0x1a   :  { %35 = vsyncpa [#allocation19], 0 }
  0x1b   :  { %37 = vsyncpa [#allocation19 + $0x1], 0 }
  0x1c   :  { %38 = vsyncpa [#allocation22], 0 }
  0x1d   :  { %40 = vsyncpa [#allocation22 + $0x1], 0 }
  0x1e   :  { %41 = vsyncpa [#allocation25], 0 }
  0x1f   :  { %43 = vsyncpa [#allocation25 + $0x1], 0 }
  0x20   :  { %44 = vsyncpa [#allocation28], 0 }
  0x21   :  { %46 = vsyncpa [#allocation28 + $0x1], 0 }
  0x22   :  { %47 = vsyncpa [#allocation31], 0 }
  0x23   :  { %48 = vsyncpa [#allocation5], 0  ;;  %s3705_s0 = smov 0   ;;  %s3707_s30 = smov 0  }
  0x24   :  { %s3709_s20 = smov 0   ;;  %s3711_s21 = smov 0  }
  0x25   :  { %s3713_s1 = smov 0   ;;  %s3715_s22 = smov 0  }
  0x26 LB: > { %4657 = sst [smem:[#allocation45_spill]] %s3555_s30  ;;  %s3734_s2 = sadd.s32 4294967295, %s3571_s22   ;;  %s3571_s22 = sphi %s3715_s22, %s54_s22   ;;  %s3567_s1 = sphi %s3713_s1, %s4723_s1   ;;  %s3563_s21 = sphi %s3711_s21, %s4722_s21   ;;  %s3559_s20 = sphi %s3709_s20, %s4721_s20   ;;  %s3555_s30 = sphi %s3707_s30, %s4720_s30   ;;  %s3551_s0 = sphi %s3705_s0, %s4717_s0  }
  0x27   : > { %4658 = sst [smem:[#allocation46_spill]] %s3563_s21  ;;  %s63_s23 = sadd.s32 1, %s3567_s1 }
  0x28   : > { %4659 = sst [smem:[#allocation47_spill]] %s3734_s2  ;;  %p64_p0 = scmp.ge.s32.totalorder %s63_s23, 2 }
  0x29   : > { %s146_s24 = sadd.s32 1, %s3559_s20  ;;  %p153_p1 = scmp.ne.s32.totalorder %s3559_s20, %s3555_s30 }
  0x2a   : > { %p154_p2 = scmp.eq.s32.totalorder %s3571_s22, 0  ;;  %s4725_s23 = smov (%p64_p0, %s63_s23), 0 }
  0x2b   : > { %4660 = sst [smem:[#allocation48_spill]] %s4725_s23  ;;  %p159_p4 = scmp.ne.s32.totalorder %s3555_s30, %s3551_s0 }
  0x2c   : > { %p3743_p3 = por %p154_p2, %p153_p1  ;;  %s143_s3 = ssub.s32 %s3567_s1, %s4725_s23 }
  0x2d   : > { %p4618_p5 = scmp.eq.s32.totalorder %s3734_s2, 0  ;;  %p144_p6 = scmp.eq.s32.totalorder %s143_s3, 0 }
  0x2e   : > { %s4661_s25 = scalar_select %p3743_p3, 1, 0 }
  0x2f   : > { %p2516_p7 = scmp.ge.s32.totalorder %s3571_s22, 1  ;;  %p3754_p8 = por %p4618_p5, %p159_p4 }
  0x30   : > { %p576_p9 = scmp.lt.s32.totalorder %s3571_s22, 3  ;;  %s3573_s29 = smov [#allocation6]  }
  0x31   : > { %s4662_s26 = scalar_select %p3754_p8, 1, 0 }
  0x32   : > { %s3760_s27 = scalar_select %p144_p6, %s3559_s20, %s146_s24  }
  0x33   : > { %4663 = sst [smem:[#allocation49_spill]] %s4662_s26  ;;  %p3762_p10 = pnand %p2516_p7, %p576_p9 }
  0x34   : > { %4664 = sst [smem:[#allocation50_spill]] %s3760_s27  ;;  %s607_s0 = sshll.u32 %s3573_s29, 4  ;;  %s608_s0 = int_to_ptr.vmem [resolvable:$true] %s607_s0 }
  0x35   : > { %s4665_s28 = scalar_select %p3762_p10, 1, 0 }
  0x36   : > { %p2774_p11 = pneg %p3762_p10  ;;  %s3574_s23 = smov [#allocation30]  }
  0x37   : > { %4666 = sst [smem:[#allocation51_spill]] %s4665_s28  ;;  %s632_s19 = sshll.u32 %s3574_s23, 4  ;;  %s3774_s19 = int_to_ptr.vmem [resolvable:$true] %s632_s19 }
  0x38   : > { %p3770_p12 = pnand %p2774_p11, %p4618_p5  ;;  %s4668_s21 = sld [smem:[#allocation53_spill]] }
  0x3a   : > { %p3784_p0 = pneg %p3770_p12 }
  0x3e   : > { %s4669_s26 = smov %s4668_s21  ;;  %s2923_s30 = scalar_lea.hbm %s4668_s21, 256 }
  0x3f   : > { %p2924_p13 = scmp.ne.s32.totalorder %s4669_s26, %s2923_s30  ;;  %p2930_p4 = scmp.lt.u32.totalorder %s2923_s30, %s4669_s26 }
  0x41   : > { %p2926_p1 = pnand %p3784_p0, %p2924_p13 }
  0x43   : > { %p2927_p2 = pneg %p2926_p1 }
  0x45   : > { %p2932_p6 = pnand %p2930_p4, %p2927_p2 }
  0x47   : > { %2935 = shalt.err (!%p2932_p6)
}
  0x48   : > { %s2936_s21 = scalar_lea.vmem %s608_s0, 256  ;;  %p2944_p5 = scmp.lt.s32.totalorder %s608_s0, %s608_s0 }
  0x49   : > { %p2937_p7 = scmp.ne.s32.totalorder %s608_s0, %s2936_s21  ;;  %p2945_p8 = scmp.lt.s32.totalorder %s2936_s21, %s2936_s21 }
  0x4b   : > { %p2939_p9 = pnand %p2937_p7, %p3784_p0  ;;  %p2946_p10 = por %p2945_p8, %p2944_p5 }
  0x4d   : > { %p2940_p11 = pneg %p2939_p9 }
  0x4f   : > { %p2947_p3 = pnand %p2946_p10, %p2940_p11 }
  0x51   : > { %2950 = shalt.err (!%p2947_p3)
}
  0x52   : > { %s4625_s16 = smov 128   ;;  %s4626_s27 = smov 8  }
  0x53   : > { %2780 = dma.hbm_to_vmem [thread:$0]  (!%p3770_p12), %s4669_s26, 256, %s608_s0, [#allocation7], %s4625_s16, %s4625_s16, %s4626_s27  }
  0x54   : > { %s4671_s17 = sld [smem:[#allocation67_spill]] }
  0x5a   : > { %s2951_s23 = scalar_lea.hbm %s4671_s17, 16 }
  0x5b   : > { %p2952_p3 = scmp.ne.s32.totalorder %s4671_s17, %s2951_s23  ;;  %p2958_p10 = scmp.lt.u32.totalorder %s2951_s23, %s4671_s17 }
  0x5d   : > { %p2954_p5 = pnand %p2952_p3, %p3784_p0 }
  0x5f   : > { %p2955_p8 = pneg %p2954_p5 }
  0x61   : > { %p2960_p13 = pnand %p2958_p10, %p2955_p8 }
  0x63   : > { %2963 = shalt.err (!%p2960_p13)
}
  0x64   : > { %s2964_s0 = scalar_lea.vmem %s3774_s19, 16  ;;  %s2971_s14 = scalar_lea.vmem %s3774_s19, 32 }
  0x65   : > { %p2965_p1 = scmp.ne.s32.totalorder %s3774_s19, %s2964_s0  ;;  %p2972_p6 = scmp.lt.s32.totalorder %s3774_s19, %s3774_s19 }
  0x66   : > { %p2973_p7 = scmp.lt.s32.totalorder %s2971_s14, %s2964_s0 }
  0x67   : > { %p2967_p2 = pnand %p2965_p1, %p3784_p0 }
  0x68   : > { %p2974_p9 = por %p2973_p7, %p2972_p6 }
  0x69   : > { %p2968_p4 = pneg %p2967_p2 }
  0x6b   : > { %p2975_p11 = pnand %p2974_p9, %p2968_p4 }
  0x6d   : > { %2978 = shalt.err (!%p2975_p11)
}
  0x6e   : > { %2786 = dma.hbm_to_vmem [thread:$0]  (!%p3770_p12), %s4671_s17, 16, %s3774_s19, [#allocation31]  }
  0x6f   : > { %s3577_s30 = smov [#allocation3]   ;;  %s3578_s28 = smov [#allocation8]  }
  0x70   : > { %s591_s2 = sshll.u32 %s3577_s30, 4  ;;  %s621_s24 = sshll.u32 %s3578_s28, 4  ;;  %s592_s2 = int_to_ptr.vmem [resolvable:$true] %s591_s2  ;;  %s622_s24 = int_to_ptr.vmem [resolvable:$true] %s621_s24 }
  0x71   : > { %s4672_s16 = sld [smem:[#allocation52_spill]] }
  0x77   : > { %s2979_s0 = scalar_lea.hbm %s4672_s16, 256 }
  0x78   : > { %p2980_p3 = scmp.ne.s32.totalorder %s4672_s16, %s2979_s0  ;;  %p2986_p10 = scmp.lt.u32.totalorder %s2979_s0, %s4672_s16 }
  0x7a   : > { %p2982_p5 = pnand %p2980_p3, %p3784_p0 }
  0x7c   : > { %p2983_p8 = pneg %p2982_p5 }
  0x7e   : > { %p2988_p13 = pnand %p2986_p10, %p2983_p8 }
  0x80   : > { %2991 = shalt.err (!%p2988_p13)
}
  0x81   : > { %s2992_s19 = scalar_lea.vmem %s592_s2, 256  ;;  %p3000_p6 = scmp.lt.s32.totalorder %s592_s2, %s592_s2 }
  0x82   : > { %p2993_p1 = scmp.ne.s32.totalorder %s592_s2, %s2992_s19  ;;  %p3001_p7 = scmp.lt.s32.totalorder %s2992_s19, %s2992_s19 }
  0x84   : > { %p2995_p2 = pnand %p2993_p1, %p3784_p0  ;;  %p3002_p9 = por %p3001_p7, %p3000_p6 }
  0x86   : > { %p2996_p4 = pneg %p2995_p2 }
  0x88   : > { %p3003_p11 = pnand %p3002_p9, %p2996_p4 }
  0x8a   : > { %3006 = shalt.err (!%p3003_p11)
}
  0x8b   : > { %s4673_s27 = smov 8   ;;  %s4674_s12 = smov 128  }
  0x8c   : > { %2777 = dma.hbm_to_vmem [thread:$0]  (!%p3770_p12), %s4672_s16, 256, %s592_s2, [#allocation4], %s4674_s12, %s4674_s12, %s4673_s27  }
  0x8d   : > { %s4675_s21 = sld [smem:[#allocation54_spill]] }
  0x93   : > { %s4676_s14 = smov %s4675_s21  ;;  %s3007_s0 = scalar_lea.hbm %s4675_s21, 128 }
  0x94   : > { %p3008_p3 = scmp.ne.s32.totalorder %s4676_s14, %s3007_s0  ;;  %p3014_p10 = scmp.lt.u32.totalorder %s3007_s0, %s4676_s14 }
  0x96   : > { %p3010_p5 = pnand %p3008_p3, %p3784_p0 }
  0x98   : > { %p3011_p8 = pneg %p3010_p5 }
  0x9a   : > { %p3016_p13 = pnand %p3014_p10, %p3011_p8 }
  0x9c   : > { %3019 = shalt.err (!%p3016_p13)
}
  0x9d   : > { %s3020_s26 = scalar_lea.vmem %s622_s24, 128  ;;  %p3028_p6 = scmp.lt.s32.totalorder %s622_s24, %s622_s24 }
  0x9e   : > { %p3021_p1 = scmp.ne.s32.totalorder %s622_s24, %s3020_s26  ;;  %p3029_p7 = scmp.lt.s32.totalorder %s3020_s26, %s3020_s26 }
  0xa0   : > { %p3023_p2 = pnand %p3021_p1, %p3784_p0  ;;  %p3030_p9 = por %p3029_p7, %p3028_p6 }
  0xa2   : > { %p3024_p4 = pneg %p3023_p2 }
  0xa4   : > { %p3031_p11 = pnand %p3030_p9, %p3024_p4 }
  0xa6   : > { %3034 = shalt.err (!%p3031_p11)
}
  0xa7   : > { %2783 = dma.hbm_to_vmem [thread:$0]  (!%p3770_p12), %s4676_s14, 128, %s622_s24, [#allocation7]  }
  0xa8   : > { %s3579_s8 = smov [#allocation32]   ;;  %s3035_s28 = scalar_lea.hbm %s4602_s18, 16 }
  0xa9   : > { %s643_s17 = sshll.u32 %s3579_s8, 4  ;;  %p3036_p3 = scmp.ne.s32.totalorder %s4602_s18, %s3035_s28  ;;  %s644_s17 = int_to_ptr.vmem [resolvable:$true] %s643_s17 }
  0xaa   : > { %p3042_p10 = scmp.lt.u32.totalorder %s3035_s28, %s4602_s18 }
  0xab   : > { %p3038_p5 = pnand %p3036_p3, %p3784_p0 }
  0xad   : > { %p3039_p8 = pneg %p3038_p5 }
  0xaf   : > { %p3044_p13 = pnand %p3042_p10, %p3039_p8 }
  0xb1   : > { %3047 = shalt.err (!%p3044_p13)
}
  0xb2   : > { %s3048_s24 = scalar_lea.vmem %s644_s17, 16  ;;  %s3055_s19 = scalar_lea.vmem %s644_s17, 32 }
  0xb3   : > { %p3049_p1 = scmp.ne.s32.totalorder %s644_s17, %s3048_s24  ;;  %p3056_p6 = scmp.lt.s32.totalorder %s644_s17, %s644_s17 }
  0xb4   : > { %p3057_p7 = scmp.lt.s32.totalorder %s3055_s19, %s3048_s24 }
  0xb5   : > { %p3051_p2 = pnand %p3049_p1, %p3784_p0 }
  0xb6   : > { %p3058_p9 = por %p3057_p7, %p3056_p6 }
  0xb7   : > { %p3052_p4 = pneg %p3051_p2 }
  0xb9   : > { %p3059_p11 = pnand %p3058_p9, %p3052_p4 }
  0xbb   : > { %3062 = shalt.err (!%p3059_p11)
}
  0xbc   : > { %2789 = dma.hbm_to_vmem [thread:$0]  (!%p3770_p12), %s4602_s18, 16, %s644_s17, [#allocation31]  }
  0xbd   : > { %p2522_p3 = scmp.ge.s32.totalorder %s3571_s22, 2 }
  0xbe   : > { %s3886_s29 = sand.u32 (!%p2522_p3), 1, %s3571_s22   ;;  %s3889_s27 = sand.u32 (!%p2522_p3), 1, %s3559_s20  }
  0xbf   : > { %650 = sbr.rel (%p2522_p3) target bundleno = 550 (0x226), region = 36  ;;  %s3892_s8 = sshll.u32 (!%p2522_p3), %s3567_s1, 4 }
  0xc0   : > { %s657_s3 = scalar_lea.vmem (!%p2522_p3), [#allocation9], %s3889_s27  ;;  %s4677_s28 = sld [smem:[#allocation55_spill]] (!%p2522_p3) }
  0xc1   : > { %s664_s12 = sshll.u32 (!%p2522_p3), %s657_s3, 4  ;;  %s4629_s21 = scalar_lea.sflag (!%p2522_p3), [#allocation10], %s3886_s29  ;;  %s665_s12 = int_to_ptr.vmem [resolvable:$true] %s664_s12 }
  0xc2   : > { %p4678_p0 = scmp.ne.s32.totalorder (!%p2522_p3), %s4661_s25, 0 }
  0xc6   : > { %s3899_s23 = scalar_lea.hbm %s4677_s28, %s3892_s8  ;;  %s3067_s19 = scalar_lea.hbm %s4677_s28, 32 }
  0xc7   : > { %s3063_s0 = scalar_lea.hbm %s3899_s23, 16  ;;  %p3068_p10 = scmp.lt.u32.totalorder %s3899_s23, %s4677_s28 }
  0xc8   : > { %p3064_p12 = scmp.ne.s32.totalorder %s3899_s23, %s3063_s0  ;;  %p3069_p13 = scmp.lt.u32.totalorder %s3067_s19, %s3063_s0 }
  0xc9   : > { %p3071_p2 = scmp.lt.u32.totalorder %s3063_s0, %s3899_s23 }
  0xca   : > { %p3065_p5 = pnand %p3064_p12, %p4678_p0  ;;  %p3070_p1 = por %p3069_p13, %p3068_p10 }
  0xcc   : > { %p3066_p8 = pneg %p3065_p5  ;;  %p3072_p4 = por %p3071_p2, %p3070_p1 }
  0xce   : > { %p3073_p6 = pnand %p3072_p4, %p3066_p8 }
  0xd0   : > { %3076 = shalt.err (!%p3073_p6)
}
  0xd1   : > { %s3077_s3 = scalar_lea.vmem %s665_s12, 16  ;;  %s3580_s30 = smov [#allocation9]  }
  0xd2   : > { %p3078_p7 = scmp.ne.s32.totalorder %s665_s12, %s3077_s3  ;;  %s3081_s17 = sshll.u32 %s3580_s30, 4  ;;  %s3082_s17 = int_to_ptr.vmem [resolvable:$false] %s3081_s17 }
  0xd3   : > { %s3083_s10 = scalar_lea.vmem %s3082_s17, 32  ;;  %p3084_p3 = scmp.lt.s32.totalorder %s665_s12, %s3082_s17 }
  0xd4   : > { %p3079_p9 = pnand %p3078_p7, %p4678_p0  ;;  %p3085_p12 = scmp.lt.s32.totalorder %s3083_s10, %s3077_s3 }
  0xd6   : > { %p3080_p11 = pneg %p3079_p9  ;;  %p3086_p5 = por %p3085_p12, %p3084_p3 }
  0xd8   : > { %p3087_p10 = pnand %p3086_p5, %p3080_p11 }
  0xda   : > { %3090 = shalt.err (!%p3087_p10)
}
  0xdb   : > { %2732 = dma.hbm_to_vmem [thread:$0]  (%p4678_p0), %s3899_s23, 16, %s665_s12, %s4629_s21  }
  0xdc   : > { %s3922_s0 = sshll.u32 %s3889_s27, 4  ;;  %s3925_s24 = sshll.u32 %s3567_s1, 8 }
  0xdd   : > { %s4679_s5 = sld [smem:[#allocation57_spill]]  ;;  %s692_s3 = scalar_lea.vmem [#allocation12], %s3922_s0 }
  0xde   : > { %s699_s30 = sshll.u32 %s692_s3, 4  ;;  %s4631_s12 = scalar_lea.sflag [#allocation13], %s3886_s29  ;;  %s3934_s30 = int_to_ptr.vmem [resolvable:$true] %s699_s30 }
  0xe3   : > { %s3931_s2 = scalar_lea.hbm %s4679_s5, %s3925_s24  ;;  %s3095_s19 = scalar_lea.hbm %s4679_s5, 512 }
  0xe4   : > { %s3091_s23 = scalar_lea.hbm %s3931_s2, 256  ;;  %p3096_p2 = scmp.lt.u32.totalorder %s3931_s2, %s4679_s5 }
  0xe5   : > { %p3092_p8 = scmp.ne.s32.totalorder %s3931_s2, %s3091_s23  ;;  %p3097_p4 = scmp.lt.u32.totalorder %s3095_s19, %s3091_s23 }
  0xe6   : > { %p3099_p7 = scmp.lt.u32.totalorder %s3091_s23, %s3931_s2 }
  0xe7   : > { %p3093_p13 = pnand %p3092_p8, %p4678_p0  ;;  %p3098_p6 = por %p3097_p4, %p3096_p2 }
  0xe9   : > { %p3094_p1 = pneg %p3093_p13  ;;  %p3100_p9 = por %p3099_p7, %p3098_p6 }
  0xeb   : > { %p3101_p11 = pnand %p3100_p9, %p3094_p1 }
  0xed   : > { %3104 = shalt.err (!%p3101_p11)
}
  0xee   : > { %s3105_s3 = scalar_lea.vmem %s3934_s30, 256  ;;  %s3581_s17 = smov [#allocation12]  }
  0xef   : > { %p3106_p3 = scmp.ne.s32.totalorder %s3934_s30, %s3105_s3  ;;  %s3109_s10 = sshll.u32 %s3581_s17, 4  ;;  %s3110_s10 = int_to_ptr.vmem [resolvable:$false] %s3109_s10 }
  0xf0   : > { %s3111_s21 = scalar_lea.vmem %s3110_s10, 512  ;;  %p3112_p10 = scmp.lt.s32.totalorder %s3934_s30, %s3110_s10 }
  0xf1   : > { %p3107_p12 = pnand %p3106_p3, %p4678_p0  ;;  %p3113_p8 = scmp.lt.s32.totalorder %s3111_s21, %s3105_s3 }
  0xf3   : > { %p3108_p5 = pneg %p3107_p12  ;;  %p3114_p13 = por %p3113_p8, %p3112_p10 }
  0xf5   : > { %p3115_p2 = pnand %p3114_p13, %p3108_p5 }
  0xf7   : > { %3118 = shalt.err (!%p3115_p2)
}
  0xf8   : > { %s4634_s23 = smov 64   ;;  %s3583_s19 = smov 4  }
  0xf9   : > { %2734 = dma.hbm_to_vmem [thread:$0]  (%p4678_p0), %s3931_s2, 256, %s3934_s30, %s4631_s12, %s4634_s23, %s4634_s23, %s3583_s19  }
  0xfa   : > { %s4680_s7 = sld [smem:[#allocation59_spill]]  ;;  %s730_s10 = scalar_lea.vmem [#allocation15], %s3922_s0 }
  0xfb   : > { %s737_s21 = sshll.u32 %s730_s10, 4  ;;  %s4632_s5 = scalar_lea.sflag [#allocation16], %s3886_s29  ;;  %s3970_s21 = int_to_ptr.vmem [resolvable:$true] %s737_s21 }
 0x100   : > { %s3967_s17 = scalar_lea.hbm %s4680_s7, %s3925_s24  ;;  %s3123_s26 = scalar_lea.hbm %s4680_s7, 512 }
 0x101   : > { %s3119_s14 = scalar_lea.hbm %s3967_s17, 256  ;;  %p3124_p7 = scmp.lt.u32.totalorder %s3967_s17, %s4680_s7 }
 0x102   : > { %p3120_p1 = scmp.ne.s32.totalorder %s3967_s17, %s3119_s14  ;;  %p3125_p9 = scmp.lt.u32.totalorder %s3123_s26, %s3119_s14 }
 0x103   : > { %p3127_p3 = scmp.lt.u32.totalorder %s3119_s14, %s3967_s17 }
 0x104   : > { %p3121_p4 = pnand %p3120_p1, %p4678_p0  ;;  %p3126_p11 = por %p3125_p9, %p3124_p7 }
 0x106   : > { %p3122_p6 = pneg %p3121_p4  ;;  %p3128_p12 = por %p3127_p3, %p3126_p11 }
 0x108   : > { %p3129_p5 = pnand %p3128_p12, %p3122_p6 }
 0x10a   : > { %3132 = shalt.err (!%p3129_p5)
}
 0x10b   : > { %s3133_s10 = scalar_lea.vmem %s3970_s21, 256  ;;  %s3584_s2 = smov [#allocation15]  }
 0x10c   : > { %p3134_p10 = scmp.ne.s32.totalorder %s3970_s21, %s3133_s10  ;;  %s3137_s30 = sshll.u32 %s3584_s2, 4  ;;  %s3138_s30 = int_to_ptr.vmem [resolvable:$false] %s3137_s30 }
 0x10d   : > { %s3139_s12 = scalar_lea.vmem %s3138_s30, 512  ;;  %p3140_p2 = scmp.lt.s32.totalorder %s3970_s21, %s3138_s30 }
 0x10e   : > { %p3135_p8 = pnand %p3134_p10, %p4678_p0  ;;  %p3141_p1 = scmp.lt.s32.totalorder %s3139_s12, %s3133_s10 }
 0x110   : > { %p3136_p13 = pneg %p3135_p8  ;;  %p3142_p4 = por %p3141_p1, %p3140_p2 }
 0x112   : > { %p3143_p7 = pnand %p3142_p4, %p3136_p13 }
 0x114   : > { %3146 = shalt.err (!%p3143_p7)
}
 0x115   : > { %2736 = dma.hbm_to_vmem [thread:$0]  (%p4678_p0), %s3967_s17, 256, %s3970_s21, %s4632_s5, %s4634_s23, %s4634_s23, %s3583_s19  }
 0x116   : > { %s4681_s9 = sld [smem:[#allocation61_spill]]  ;;  %s768_s10 = scalar_lea.vmem [#allocation18], %s3922_s0 }
 0x117   : > { %s775_s2 = sshll.u32 %s768_s10, 4  ;;  %s4633_s30 = scalar_lea.sflag [#allocation19], %s3886_s29  ;;  %s4006_s2 = int_to_ptr.vmem [resolvable:$true] %s775_s2 }
 0x11c   : > { %s4003_s3 = scalar_lea.hbm %s4681_s9, %s3925_s24  ;;  %s3151_s14 = scalar_lea.hbm %s4681_s9, 512 }
 0x11d   : > { %s3147_s12 = scalar_lea.hbm %s4003_s3, 256  ;;  %p3152_p3 = scmp.lt.u32.totalorder %s4003_s3, %s4681_s9 }
 0x11e   : > { %p3148_p6 = scmp.ne.s32.totalorder %s4003_s3, %s3147_s12  ;;  %p3153_p12 = scmp.lt.u32.totalorder %s3151_s14, %s3147_s12 }
 0x11f   : > { %p3155_p10 = scmp.lt.u32.totalorder %s3147_s12, %s4003_s3 }
 0x120   : > { %p3149_p9 = pnand %p3148_p6, %p4678_p0  ;;  %p3154_p5 = por %p3153_p12, %p3152_p3 }
 0x122   : > { %p3150_p11 = pneg %p3149_p9  ;;  %p3156_p8 = por %p3155_p10, %p3154_p5 }
 0x124   : > { %p3157_p13 = pnand %p3156_p8, %p3150_p11 }
 0x126   : > { %3160 = shalt.err (!%p3157_p13)
}
 0x127   : > { %s3161_s10 = scalar_lea.vmem %s4006_s2, 256  ;;  %s3585_s17 = smov [#allocation18]  }
 0x128   : > { %p3162_p2 = scmp.ne.s32.totalorder %s4006_s2, %s3161_s10  ;;  %s3165_s21 = sshll.u32 %s3585_s17, 4  ;;  %s3166_s21 = int_to_ptr.vmem [resolvable:$false] %s3165_s21 }
 0x129   : > { %s3167_s5 = scalar_lea.vmem %s3166_s21, 512  ;;  %p3168_p7 = scmp.lt.s32.totalorder %s4006_s2, %s3166_s21 }
 0x12a   : > { %p3163_p1 = pnand %p3162_p2, %p4678_p0  ;;  %p3169_p6 = scmp.lt.s32.totalorder %s3167_s5, %s3161_s10 }
 0x12c   : > { %p3164_p4 = pneg %p3163_p1  ;;  %p3170_p9 = por %p3169_p6, %p3168_p7 }
 0x12e   : > { %p3171_p3 = pnand %p3170_p9, %p3164_p4 }
 0x130   : > { %3174 = shalt.err (!%p3171_p3)
}
 0x131   : > { %2738 = dma.hbm_to_vmem [thread:$0]  (%p4678_p0), %s4003_s3, 256, %s4006_s2, %s4633_s30, %s4634_s23, %s4634_s23, %s3583_s19  }
 0x132   : > { %s4682_s11 = sld [smem:[#allocation63_spill]]  ;;  %s805_s10 = scalar_lea.vmem [#allocation21], %s3889_s27 }
 0x133   : > { %s812_s17 = sshll.u32 %s805_s10, 4  ;;  %s4636_s21 = scalar_lea.sflag [#allocation22], %s3886_s29  ;;  %s813_s17 = int_to_ptr.vmem [resolvable:$true] %s812_s17 }
 0x138   : > { %s4039_s26 = scalar_lea.hbm %s4682_s11, %s3892_s8  ;;  %s3179_s2 = scalar_lea.hbm %s4682_s11, 32 }
 0x139   : > { %s3175_s5 = scalar_lea.hbm %s4039_s26, 16  ;;  %p3180_p10 = scmp.lt.u32.totalorder %s4039_s26, %s4682_s11 }
 0x13a   : > { %p3176_p11 = scmp.ne.s32.totalorder %s4039_s26, %s3175_s5  ;;  %p3181_p8 = scmp.lt.u32.totalorder %s3179_s2, %s3175_s5 }
 0x13b   : > { %p3183_p2 = scmp.lt.u32.totalorder %s3175_s5, %s4039_s26 }
 0x13c   : > { %p3177_p12 = pnand %p3176_p11, %p4678_p0  ;;  %p3182_p13 = por %p3181_p8, %p3180_p10 }
 0x13e   : > { %p3178_p5 = pneg %p3177_p12  ;;  %p3184_p1 = por %p3183_p2, %p3182_p13 }
 0x140   : > { %p3185_p4 = pnand %p3184_p1, %p3178_p5 }
 0x142   : > { %3188 = shalt.err (!%p3185_p4)
}
 0x143   : > { %s3189_s10 = scalar_lea.vmem %s813_s17, 16  ;;  %s3586_s30 = smov [#allocation21]  }
 0x144   : > { %p3190_p7 = scmp.ne.s32.totalorder %s813_s17, %s3189_s10  ;;  %s3193_s23 = sshll.u32 %s3586_s30, 4  ;;  %s3194_s23 = int_to_ptr.vmem [resolvable:$false] %s3193_s23 }
 0x145   : > { %s3195_s7 = scalar_lea.vmem %s3194_s23, 32  ;;  %p3196_p3 = scmp.lt.s32.totalorder %s813_s17, %s3194_s23 }
 0x146   : > { %p3191_p6 = pnand %p3190_p7, %p4678_p0  ;;  %p3197_p11 = scmp.lt.s32.totalorder %s3195_s7, %s3189_s10 }
 0x148   : > { %p3192_p9 = pneg %p3191_p6  ;;  %p3198_p12 = por %p3197_p11, %p3196_p3 }
 0x14a   : > { %p3199_p8 = pnand %p3198_p12, %p3192_p9 }
 0x14c   : > { %3202 = shalt.err (!%p3199_p8)
}
 0x14d   : > { %2740 = dma.hbm_to_vmem [thread:$0]  (%p4678_p0), %s4039_s26, 16, %s813_s17, %s4636_s21  }
 0x14e   : > { %s4066_s30 = scalar_lea.hbm %s4597_s13, %s3925_s24  ;;  %s840_s23 = scalar_lea.vmem [#allocation24], %s3922_s0 }
 0x14f   : > { %s847_s2 = sshll.u32 %s840_s23, 4  ;;  %s4637_s12 = scalar_lea.sflag [#allocation25], %s3886_s29  ;;  %s4069_s2 = int_to_ptr.vmem [resolvable:$true] %s847_s2 }
 0x150   : > { %s3203_s14 = scalar_lea.hbm %s4066_s30, 256  ;;  %s3207_s10 = scalar_lea.hbm %s4597_s13, 512 }
 0x151   : > { %p3204_p5 = scmp.ne.s32.totalorder %s4066_s30, %s3203_s14  ;;  %p3208_p2 = scmp.lt.u32.totalorder %s4066_s30, %s4597_s13 }
 0x152   : > { %p3209_p1 = scmp.lt.u32.totalorder %s3207_s10, %s3203_s14  ;;  %p3211_p7 = scmp.lt.u32.totalorder %s3203_s14, %s4066_s30 }
 0x153   : > { %p3205_p10 = pnand %p3204_p5, %p4678_p0 }
 0x154   : > { %p3210_p4 = por %p3209_p1, %p3208_p2 }
 0x155   : > { %p3206_p13 = pneg %p3205_p10 }
 0x156   : > { %p3212_p6 = por %p3211_p7, %p3210_p4 }
 0x158   : > { %p3213_p9 = pnand %p3212_p6, %p3206_p13 }
 0x15a   : > { %3216 = shalt.err (!%p3213_p9)
}
 0x15b   : > { %s3217_s3 = scalar_lea.vmem %s4069_s2, 256  ;;  %s3587_s23 = smov [#allocation24]  }
 0x15c   : > { %p3218_p3 = scmp.ne.s32.totalorder %s4069_s2, %s3217_s3  ;;  %s3221_s26 = sshll.u32 %s3587_s23, 4  ;;  %s3222_s26 = int_to_ptr.vmem [resolvable:$false] %s3221_s26 }
 0x15d   : > { %s3223_s17 = scalar_lea.vmem %s3222_s26, 512  ;;  %p3224_p8 = scmp.lt.s32.totalorder %s4069_s2, %s3222_s26 }
 0x15e   : > { %p3219_p11 = pnand %p3218_p3, %p4678_p0  ;;  %p3225_p5 = scmp.lt.s32.totalorder %s3223_s17, %s3217_s3 }
 0x160   : > { %p3220_p12 = pneg %p3219_p11  ;;  %p3226_p10 = por %p3225_p5, %p3224_p8 }
 0x162   : > { %p3227_p2 = pnand %p3226_p10, %p3220_p12 }
 0x164   : > { %3230 = shalt.err (!%p3227_p2)
}
 0x165   : > { %s4683_s14 = smov 64   ;;  %s4102_s5 = scalar_lea.hbm %s4599_s15, %s3925_s24 }
 0x166   : > { %2742 = dma.hbm_to_vmem [thread:$0]  (%p4678_p0), %s4066_s30, 256, %s4069_s2, %s4637_s12, %s4683_s14, %s4683_s14, %s3583_s19  }
 0x167   : > { %s878_s3 = scalar_lea.vmem [#allocation27], %s3922_s0  ;;  %s4684_s4 = sld [smem:[#allocation56_spill]] }
 0x168   : > { %s885_s23 = sshll.u32 %s878_s3, 4  ;;  %s4638_s9 = scalar_lea.sflag [#allocation28], %s3886_s29  ;;  %s4105_s23 = int_to_ptr.vmem [resolvable:$true] %s885_s23 }
 0x169   : > { %s3231_s30 = scalar_lea.hbm %s4102_s5, 256  ;;  %s3235_s10 = scalar_lea.hbm %s4599_s15, 512 }
 0x16a   : > { %p3232_p13 = scmp.ne.s32.totalorder %s4102_s5, %s3231_s30  ;;  %p3236_p7 = scmp.lt.u32.totalorder %s4102_s5, %s4599_s15 }
 0x16b   : > { %p3237_p6 = scmp.lt.u32.totalorder %s3235_s10, %s3231_s30  ;;  %p3239_p3 = scmp.lt.u32.totalorder %s3231_s30, %s4102_s5 }
 0x16c   : > { %p3233_p1 = pnand %p3232_p13, %p4678_p0 }
 0x16d   : > { %s4111_s21 = scalar_lea.hbm %s4684_s4, %s3892_s8  ;;  %p3238_p9 = por %p3237_p6, %p3236_p7 }
 0x16e   : > { %p3234_p4 = pneg %p3233_p1 }
 0x16f   : > { %p3240_p11 = por %p3239_p3, %p3238_p9 }
 0x171   : > { %p3241_p12 = pnand %p3240_p11, %p3234_p4 }
 0x173   : > { %3244 = shalt.err (!%p3241_p12)
}
 0x174   : > { %s3245_s3 = scalar_lea.vmem %s4105_s23, 256  ;;  %s3588_s26 = smov [#allocation27]  }
 0x175   : > { %p3246_p8 = scmp.ne.s32.totalorder %s4105_s23, %s3245_s3  ;;  %s3249_s17 = sshll.u32 %s3588_s26, 4  ;;  %s3250_s17 = int_to_ptr.vmem [resolvable:$false] %s3249_s17 }
 0x176   : > { %s3251_s24 = scalar_lea.vmem %s3250_s17, 512  ;;  %p3252_p2 = scmp.lt.s32.totalorder %s4105_s23, %s3250_s17 }
 0x177   : > { %p3247_p5 = pnand %p3246_p8, %p4678_p0  ;;  %p3253_p13 = scmp.lt.s32.totalorder %s3251_s24, %s3245_s3 }
 0x179   : > { %p3248_p10 = pneg %p3247_p5  ;;  %p3254_p1 = por %p3253_p13, %p3252_p2 }
 0x17b   : > { %p3255_p7 = pnand %p3254_p1, %p3248_p10 }
 0x17d   : > { %3258 = shalt.err (!%p3255_p7)
}
 0x17e   : > { %2744 = dma.hbm_to_vmem [thread:$0]  (%p4678_p0), %s4102_s5, 256, %s4105_s23, %s4638_s9, %s4683_s14, %s4683_s14, %s3583_s19  }
 0x17f   : > { %s674_s30 = scalar_lea.vmem [#allocation11], %s3889_s27  ;;  %s4685_s6 = sld [smem:[#allocation58_spill]] }
 0x180   : > { %s681_s2 = sshll.u32 %s674_s30, 4  ;;  %s3259_s3 = scalar_lea.hbm %s4111_s21, 16  ;;  %s682_s2 = int_to_ptr.vmem [resolvable:$true] %s681_s2 }
 0x181   : > { %p3260_p4 = scmp.ne.s32.totalorder %s4111_s21, %s3259_s3  ;;  %s3263_s24 = scalar_lea.hbm %s4684_s4, 32 }
 0x182   : > { %p3264_p3 = scmp.lt.u32.totalorder %s4111_s21, %s4684_s4  ;;  %p3265_p11 = scmp.lt.u32.totalorder %s3263_s24, %s3259_s3 }
 0x183   : > { %p3261_p6 = pnand %p3260_p4, %p4678_p0  ;;  %p3267_p8 = scmp.lt.u32.totalorder %s3259_s3, %s4111_s21 }
 0x184   : > { %p3266_p12 = por %p3265_p11, %p3264_p3 }
 0x185   : > { %s4145_s0 = scalar_lea.hbm %s4685_s6, %s3892_s8  ;;  %p3262_p9 = pneg %p3261_p6 }
 0x186   : > { %p3268_p5 = por %p3267_p8, %p3266_p12 }
 0x188   : > { %p3269_p10 = pnand %p3268_p5, %p3262_p9 }
 0x18a   : > { %3272 = shalt.err (!%p3269_p10)
}
 0x18b   : > { %s3273_s19 = scalar_lea.vmem %s682_s2, 16  ;;  %s3589_s14 = smov [#allocation11]  }
 0x18c   : > { %p3274_p2 = scmp.ne.s32.totalorder %s682_s2, %s3273_s19  ;;  %s3277_s5 = sshll.u32 %s3589_s14, 4  ;;  %s3278_s5 = int_to_ptr.vmem [resolvable:$false] %s3277_s5 }
 0x18d   : > { %s3279_s23 = scalar_lea.vmem %s3278_s5, 32  ;;  %p3280_p7 = scmp.lt.s32.totalorder %s682_s2, %s3278_s5 }
 0x18e   : > { %p3275_p13 = pnand %p3274_p2, %p4678_p0  ;;  %p3281_p4 = scmp.lt.s32.totalorder %s3279_s23, %s3273_s19 }
 0x190   : > { %p3276_p1 = pneg %p3275_p13  ;;  %p3282_p6 = por %p3281_p4, %p3280_p7 }
 0x192   : > { %p3283_p3 = pnand %p3282_p6, %p3276_p1 }
 0x194   : > { %3286 = shalt.err (!%p3283_p3)
}
 0x195   : > { %s4686_s11 = scalar_lea.sflag [#allocation10], %s3886_s29  ;;  %s712_s12 = scalar_lea.vmem [#allocation14], %s3889_s27 }
 0x196   : > { %2733 = dma.hbm_to_vmem [thread:$0]  (%p4678_p0), %s4111_s21, 16, %s682_s2, %s4686_s11  }
 0x197   : > { %s719_s30 = sshll.u32 %s712_s12, 4  ;;  %s4687_s3 = sld [smem:[#allocation60_spill]]  ;;  %s720_s30 = int_to_ptr.vmem [resolvable:$true] %s719_s30 }
 0x198   : > { %s3287_s17 = scalar_lea.hbm %s4145_s0, 16  ;;  %s3291_s14 = scalar_lea.hbm %s4685_s6, 32 }
 0x199   : > { %p3288_p9 = scmp.ne.s32.totalorder %s4145_s0, %s3287_s17  ;;  %p3292_p8 = scmp.lt.u32.totalorder %s4145_s0, %s4685_s6 }
 0x19a   : > { %p3293_p5 = scmp.lt.u32.totalorder %s3291_s14, %s3287_s17  ;;  %p3295_p2 = scmp.lt.u32.totalorder %s3287_s17, %s4145_s0 }
 0x19b   : > { %p3289_p11 = pnand %p3288_p9, %p4678_p0 }
 0x19c   : > { %p3294_p10 = por %p3293_p5, %p3292_p8 }
 0x19d   : > { %s4171_s26 = scalar_lea.hbm %s4687_s3, %s3892_s8  ;;  %p3290_p12 = pneg %p3289_p11 }
 0x19e   : > { %p3296_p13 = por %p3295_p2, %p3294_p10 }
 0x1a0   : > { %p3297_p1 = pnand %p3296_p13, %p3290_p12 }
 0x1a2   : > { %3300 = shalt.err (!%p3297_p1)
}
 0x1a3   : > { %s3301_s21 = scalar_lea.vmem %s720_s30, 16  ;;  %s3590_s2 = smov [#allocation14]  }
 0x1a4   : > { %p3302_p7 = scmp.ne.s32.totalorder %s720_s30, %s3301_s21  ;;  %s3305_s11 = sshll.u32 %s3590_s2, 4  ;;  %s3306_s11 = int_to_ptr.vmem [resolvable:$false] %s3305_s11 }
 0x1a5   : > { %s3307_s12 = scalar_lea.vmem %s3306_s11, 32  ;;  %p3308_p3 = scmp.lt.s32.totalorder %s720_s30, %s3306_s11 }
 0x1a6   : > { %p3303_p4 = pnand %p3302_p7, %p4678_p0  ;;  %p3309_p9 = scmp.lt.s32.totalorder %s3307_s12, %s3301_s21 }
 0x1a8   : > { %p3304_p6 = pneg %p3303_p4  ;;  %p3310_p11 = por %p3309_p9, %p3308_p3 }
 0x1aa   : > { %p3311_p5 = pnand %p3310_p11, %p3304_p6 }
 0x1ac   : > { %3314 = shalt.err (!%p3311_p5)
}
 0x1ad   : > { %s4688_s10 = scalar_lea.sflag [#allocation13], %s3886_s29  ;;  %s750_s7 = scalar_lea.vmem [#allocation17], %s3889_s27 }
 0x1ae   : > { %2735 = dma.hbm_to_vmem [thread:$0]  (%p4678_p0), %s4145_s0, 16, %s720_s30, %s4688_s10  }
 0x1af   : > { %s757_s17 = sshll.u32 %s750_s7, 4  ;;  %s4689_s14 = sld [smem:[#allocation62_spill]]  ;;  %s758_s17 = int_to_ptr.vmem [resolvable:$true] %s757_s17 }
 0x1b0   : > { %s3315_s23 = scalar_lea.hbm %s4171_s26, 16  ;;  %s3319_s11 = scalar_lea.hbm %s4687_s3, 32 }
 0x1b1   : > { %p3316_p12 = scmp.ne.s32.totalorder %s4171_s26, %s3315_s23  ;;  %p3320_p2 = scmp.lt.u32.totalorder %s4171_s26, %s4687_s3 }
 0x1b2   : > { %p3321_p13 = scmp.lt.u32.totalorder %s3319_s11, %s3315_s23  ;;  %p3323_p7 = scmp.lt.u32.totalorder %s3315_s23, %s4171_s26 }
 0x1b3   : > { %p3317_p8 = pnand %p3316_p12, %p4678_p0 }
 0x1b4   : > { %p3322_p1 = por %p3321_p13, %p3320_p2 }
 0x1b5   : > { %s4197_s5 = scalar_lea.hbm %s4689_s14, %s3892_s8  ;;  %p3318_p10 = pneg %p3317_p8 }
 0x1b6   : > { %p3324_p4 = por %p3323_p7, %p3322_p1 }
 0x1b8   : > { %p3325_p6 = pnand %p3324_p4, %p3318_p10 }
 0x1ba   : > { %3328 = shalt.err (!%p3325_p6)
}
 0x1bb   : > { %s3329_s0 = scalar_lea.vmem %s758_s17, 16  ;;  %s3591_s30 = smov [#allocation17]  }
 0x1bc   : > { %p3330_p3 = scmp.ne.s32.totalorder %s758_s17, %s3329_s0  ;;  %s3333_s10 = sshll.u32 %s3591_s30, 4  ;;  %s3334_s10 = int_to_ptr.vmem [resolvable:$false] %s3333_s10 }
 0x1bd   : > { %s3335_s7 = scalar_lea.vmem %s3334_s10, 32  ;;  %p3336_p5 = scmp.lt.s32.totalorder %s758_s17, %s3334_s10 }
 0x1be   : > { %p3331_p9 = pnand %p3330_p3, %p4678_p0  ;;  %p3337_p12 = scmp.lt.s32.totalorder %s3335_s7, %s3329_s0 }
 0x1c0   : > { %p3332_p11 = pneg %p3331_p9  ;;  %p3338_p8 = por %p3337_p12, %p3336_p5 }
 0x1c2   : > { %p3339_p2 = pnand %p3338_p8, %p3332_p11 }
 0x1c4   : > { %3342 = shalt.err (!%p3339_p2)
}
 0x1c5   : > { %s4690_s9 = scalar_lea.sflag [#allocation16], %s3886_s29  ;;  %s788_s24 = scalar_lea.vmem [#allocation20], %s3889_s27 }
 0x1c6   : > { %2737 = dma.hbm_to_vmem [thread:$0]  (%p4678_p0), %s4171_s26, 16, %s758_s17, %s4690_s9  }
 0x1c7   : > { %s795_s19 = sshll.u32 %s788_s24, 4  ;;  %s4691_s2 = sld [smem:[#allocation64_spill]]  ;;  %s796_s19 = int_to_ptr.vmem [resolvable:$true] %s795_s19 }
 0x1c8   : > { %s3343_s12 = scalar_lea.hbm %s4197_s5, 16  ;;  %s3347_s10 = scalar_lea.hbm %s4689_s14, 32 }
 0x1c9   : > { %p3344_p10 = scmp.ne.s32.totalorder %s4197_s5, %s3343_s12  ;;  %p3348_p7 = scmp.lt.u32.totalorder %s4197_s5, %s4689_s14 }
 0x1ca   : > { %p3349_p4 = scmp.lt.u32.totalorder %s3347_s10, %s3343_s12  ;;  %p3351_p3 = scmp.lt.u32.totalorder %s3343_s12, %s4197_s5 }
 0x1cb   : > { %p3345_p13 = pnand %p3344_p10, %p4678_p0 }
 0x1cc   : > { %p3350_p6 = por %p3349_p4, %p3348_p7 }
 0x1cd   : > { %s4223_s11 = scalar_lea.hbm %s4691_s2, %s3892_s8  ;;  %p3346_p1 = pneg %p3345_p13 }
 0x1ce   : > { %p3352_p9 = por %p3351_p3, %p3350_p6 }
 0x1d0   : > { %p3353_p11 = pnand %p3352_p9, %p3346_p1 }
 0x1d2   : > { %3356 = shalt.err (!%p3353_p11)
}
 0x1d3   : > { %s3357_s26 = scalar_lea.vmem %s796_s19, 16  ;;  %s3592_s17 = smov [#allocation20]  }
 0x1d4   : > { %p3358_p5 = scmp.ne.s32.totalorder %s796_s19, %s3357_s26  ;;  %s3361_s9 = sshll.u32 %s3592_s17, 4  ;;  %s3362_s9 = int_to_ptr.vmem [resolvable:$false] %s3361_s9 }
 0x1d5   : > { %s3363_s24 = scalar_lea.vmem %s3362_s9, 32  ;;  %p3364_p2 = scmp.lt.s32.totalorder %s796_s19, %s3362_s9 }
 0x1d6   : > { %p3359_p12 = pnand %p3358_p5, %p4678_p0  ;;  %p3365_p10 = scmp.lt.s32.totalorder %s3363_s24, %s3357_s26 }
 0x1d8   : > { %p3360_p8 = pneg %p3359_p12  ;;  %p3366_p13 = por %p3365_p10, %p3364_p2 }
 0x1da   : > { %p3367_p4 = pnand %p3366_p13, %p3360_p8 }
 0x1dc   : > { %3370 = shalt.err (!%p3367_p4)
}
 0x1dd   : > { %s4692_s3 = scalar_lea.sflag [#allocation19], %s3886_s29  ;;  %s822_s23 = scalar_lea.vmem [#allocation23], %s3889_s27 }
 0x1de   : > { %2739 = dma.hbm_to_vmem [thread:$0]  (%p4678_p0), %s4197_s5, 16, %s796_s19, %s4692_s3  }
 0x1df   : > { %s829_s21 = sshll.u32 %s822_s23, 4  ;;  %s4693_s30 = sld [smem:[#allocation65_spill]]  ;;  %s830_s21 = int_to_ptr.vmem [resolvable:$true] %s829_s21 }
 0x1e0   : > { %s3371_s26 = scalar_lea.hbm %s4223_s11, 16  ;;  %s3375_s24 = scalar_lea.hbm %s4691_s2, 32 }
 0x1e1   : > { %p3372_p1 = scmp.ne.s32.totalorder %s4223_s11, %s3371_s26  ;;  %p3376_p3 = scmp.lt.u32.totalorder %s4223_s11, %s4691_s2 }
 0x1e2   : > { %p3377_p9 = scmp.lt.u32.totalorder %s3375_s24, %s3371_s26  ;;  %p3379_p5 = scmp.lt.u32.totalorder %s3371_s26, %s4223_s11 }
 0x1e3   : > { %p3373_p7 = pnand %p3372_p1, %p4678_p0 }
 0x1e4   : > { %p3378_p11 = por %p3377_p9, %p3376_p3 }
 0x1e5   : > { %s4694_s10 = smov %s4693_s30  ;;  %s4249_s7 = scalar_lea.hbm %s4693_s30, %s3892_s8 }
 0x1e6   : > { %p3374_p6 = pneg %p3373_p7  ;;  %p3380_p12 = por %p3379_p5, %p3378_p11 }
 0x1e8   : > { %p3381_p8 = pnand %p3380_p12, %p3374_p6 }
 0x1ea   : > { %3384 = shalt.err (!%p3381_p8)
}
 0x1eb   : > { %s3385_s5 = scalar_lea.vmem %s830_s21, 16  ;;  %s3593_s19 = smov [#allocation23]  }
 0x1ec   : > { %p3386_p2 = scmp.ne.s32.totalorder %s830_s21, %s3385_s5  ;;  %s3389_s3 = sshll.u32 %s3593_s19, 4  ;;  %s3390_s3 = int_to_ptr.vmem [resolvable:$false] %s3389_s3 }
 0x1ed   : > { %s3391_s23 = scalar_lea.vmem %s3390_s3, 32  ;;  %p3392_p4 = scmp.lt.s32.totalorder %s830_s21, %s3390_s3 }
 0x1ee   : > { %p3387_p10 = pnand %p3386_p2, %p4678_p0  ;;  %p3393_p1 = scmp.lt.s32.totalorder %s3391_s23, %s3385_s5 }
 0x1f0   : > { %p3388_p13 = pneg %p3387_p10  ;;  %p3394_p7 = por %p3393_p1, %p3392_p4 }
 0x1f2   : > { %p3395_p3 = pnand %p3394_p7, %p3388_p13 }
 0x1f4   : > { %3398 = shalt.err (!%p3395_p3)
}
 0x1f5   : > { %s4695_s4 = scalar_lea.sflag [#allocation22], %s3886_s29  ;;  %s860_s6 = scalar_lea.vmem [#allocation26], %s3889_s27 }
 0x1f6   : > { %2741 = dma.hbm_to_vmem [thread:$0]  (%p4678_p0), %s4223_s11, 16, %s830_s21, %s4695_s4  }
 0x1f7   : > { %s867_s12 = sshll.u32 %s860_s6, 4  ;;  %s4696_s26 = sld [smem:[#allocation66_spill]]  ;;  %s868_s12 = int_to_ptr.vmem [resolvable:$true] %s867_s12 }
 0x1f8   : > { %s3399_s9 = scalar_lea.hbm %s4249_s7, 16  ;;  %s3403_s19 = scalar_lea.hbm %s4694_s10, 32 }
 0x1f9   : > { %p3400_p6 = scmp.ne.s32.totalorder %s4249_s7, %s3399_s9  ;;  %p3404_p5 = scmp.lt.u32.totalorder %s4249_s7, %s4694_s10 }
 0x1fa   : > { %p3405_p12 = scmp.lt.u32.totalorder %s3403_s19, %s3399_s9  ;;  %p3407_p2 = scmp.lt.u32.totalorder %s3399_s9, %s4249_s7 }
 0x1fb   : > { %p3401_p9 = pnand %p3400_p6, %p4678_p0 }
 0x1fc   : > { %p3406_p8 = por %p3405_p12, %p3404_p5 }
 0x1fd   : > { %s4275_s17 = scalar_lea.hbm %s4696_s26, %s3892_s8  ;;  %p3402_p11 = pneg %p3401_p9 }
 0x1fe   : > { %p3408_p10 = por %p3407_p2, %p3406_p8 }
 0x200   : > { %p3409_p13 = pnand %p3408_p10, %p3402_p11 }
 0x202   : > { %3412 = shalt.err (!%p3409_p13)
}
 0x203   : > { %s3413_s8 = scalar_lea.vmem %s868_s12, 16  ;;  %s3594_s11 = smov [#allocation26]  }
 0x204   : > { %p3414_p4 = scmp.ne.s32.totalorder %s868_s12, %s3413_s8  ;;  %s3417_s21 = sshll.u32 %s3594_s11, 4  ;;  %s3418_s21 = int_to_ptr.vmem [resolvable:$false] %s3417_s21 }
 0x205   : > { %s3419_s4 = scalar_lea.vmem %s3418_s21, 32  ;;  %p3420_p3 = scmp.lt.s32.totalorder %s868_s12, %s3418_s21 }
 0x206   : > { %p3415_p1 = pnand %p3414_p4, %p4678_p0  ;;  %p3421_p6 = scmp.lt.s32.totalorder %s3419_s4, %s3413_s8 }
 0x208   : > { %p3416_p7 = pneg %p3415_p1  ;;  %p3422_p9 = por %p3421_p6, %p3420_p3 }
 0x20a   : > { %p3423_p5 = pnand %p3422_p9, %p3416_p7 }
 0x20c   : > { %3426 = shalt.err (!%p3423_p5)
}
 0x20d   : > { %s4697_s6 = scalar_lea.sflag [#allocation25], %s3886_s29  ;;  %s898_s0 = scalar_lea.vmem [#allocation29], %s3889_s27 }
 0x20e   : > { %2743 = dma.hbm_to_vmem [thread:$0]  (%p4678_p0), %s4249_s7, 16, %s868_s12, %s4697_s6  }
 0x20f   : > { %s905_s30 = sshll.u32 %s898_s0, 4  ;;  %s3427_s9 = scalar_lea.hbm %s4275_s17, 16  ;;  %s906_s30 = int_to_ptr.vmem [resolvable:$true] %s905_s30 }
 0x210   : > { %p3428_p11 = scmp.ne.s32.totalorder %s4275_s17, %s3427_s9  ;;  %s3431_s19 = scalar_lea.hbm %s4696_s26, 32 }
 0x211   : > { %p3432_p2 = scmp.lt.u32.totalorder %s4275_s17, %s4696_s26  ;;  %p3433_p10 = scmp.lt.u32.totalorder %s3431_s19, %s3427_s9 }
 0x212   : > { %p3429_p12 = pnand %p3428_p11, %p4678_p0  ;;  %p3435_p4 = scmp.lt.u32.totalorder %s3427_s9, %s4275_s17 }
 0x213   : > { %p3434_p13 = por %p3433_p10, %p3432_p2 }
 0x214   : > { %p3430_p8 = pneg %p3429_p12 }
 0x215   : > { %p3436_p1 = por %p3435_p4, %p3434_p13 }
 0x217   : > { %p3437_p7 = pnand %p3436_p1, %p3430_p8 }
 0x219   : > { %3440 = shalt.err (!%p3437_p7)
}
 0x21a   : > { %s3441_s27 = scalar_lea.vmem %s906_s30, 16  ;;  %s3595_s7 = smov [#allocation29]  }
 0x21b   : > { %p3442_p3 = scmp.ne.s32.totalorder %s906_s30, %s3441_s27  ;;  %s3445_s12 = sshll.u32 %s3595_s7, 4  ;;  %s3446_s12 = int_to_ptr.vmem [resolvable:$false] %s3445_s12 }
 0x21c   : > { %s3447_s8 = scalar_lea.vmem %s3446_s12, 32  ;;  %p3448_p5 = scmp.lt.s32.totalorder %s906_s30, %s3446_s12 }
 0x21d   : > { %p3443_p6 = pnand %p3442_p3, %p4678_p0  ;;  %p3449_p11 = scmp.lt.s32.totalorder %s3447_s8, %s3441_s27 }
 0x21f   : > { %p3444_p9 = pneg %p3443_p6  ;;  %p3450_p12 = por %p3449_p11, %p3448_p5 }
 0x221   : > { %p3451_p2 = pnand %p3450_p12, %p3444_p9 }
 0x223   : > { %3454 = shalt.err (!%p3451_p2)
}
 0x224   : > { %s4698_s11 = scalar_lea.sflag [#allocation28], %s3886_s29 }
 0x225   : > { %2745 = dma.hbm_to_vmem [thread:$0]  (%p4678_p0), %s4275_s17, 16, %s906_s30, %s4698_s11  }
 0x226 PF: > { %s4699_s21 = sld [smem:[#allocation51_spill]] }
 0x22c   : > { %p4700_p8 = scmp.ne.s32.totalorder %s4699_s21, 0 }
 0x22d   : > { %s4701_s4 = sld [smem:[#allocation47_spill]] (!%p4700_p8) }
 0x22e   : > { %914 = sbr.rel (%p4700_p8) target bundleno = 3462 (0xd86), region = 96 }
 0x233   : > { %p4702_p10 = scmp.eq.s32.totalorder (!%p4700_p8), %s4701_s4, 0 }
 0x235   : > { %3506 = dma.done.wait (%p4702_p10), [#allocation4], 256   ;;  %p4703_p13 = pmov %p4702_p10 }
 0x236   : > { %p4704_p4 = pmov %p4702_p10 }
 0x237   : > { %3508 = vsyncadd (%p4703_p13), [#allocation4], 4294967040 }
 0x238   : > { %3510 = dma.done.wait (%p4704_p4), [#allocation7], 384   ;;  %p4705_p1 = pmov %p4704_p4 }
 0x239   : > { %s4706_s25 = sld [smem:[#allocation45_spill]]  ;;  %s4707_s29 = sld [smem:[#allocation49_spill]] }
 0x23a   : > { %3512 = vsyncadd (%p4705_p1), [#allocation7], 4294966912  ;;  %s4327_s17 = sand.u32 1, %s4701_s4  }
 0x23b   : > { %s929_s0 = scalar_lea.sflag [#allocation10], %s4327_s17 }
 0x23f   : > { %s4330_s6 = sand.u32 1, %s4706_s25   ;;  %p4708_p0 = scmp.ne.s32.totalorder %s4707_s29, 0 }
 0x240   : > { %s931_s30 = scalar_lea.vmem [#allocation9], %s4330_s6 }
 0x241   : > { %3514 = dma.done.wait (%p4708_p0), %s929_s0, 32  }
 0x242   : > { %3516 = vsyncadd (%p4708_p0), %s929_s0, 4294967264  ;;  %s4339_s9 = sshll.u32 %s4330_s6, 4  ;;  %s939_s24 = scalar_lea.vmem [#allocation11], %s4330_s6 }
 0x243   : > { %s945_s5 = scalar_lea.sflag [#allocation13], %s4327_s17  ;;  %s948_s19 = scalar_lea.vmem [#allocation12], %s4339_s9 }
 0x244   : > { %3518 = dma.done.wait (%p4708_p0), %s945_s5, 272  }
 0x245   : > { %3520 = vsyncadd (%p4708_p0), %s945_s5, 4294967024  ;;  %s956_s3 = scalar_lea.vmem [#allocation14], %s4330_s6  ;;  %s962_s23 = scalar_lea.sflag [#allocation16], %s4327_s17 }
 0x246   : > { %s965_s27 = scalar_lea.vmem [#allocation15], %s4339_s9 }
 0x247   : > { %3522 = dma.done.wait (%p4708_p0), %s962_s23, 272  }
 0x248   : > { %3524 = vsyncadd (%p4708_p0), %s962_s23, 4294967024  ;;  %s973_s7 = scalar_lea.vmem [#allocation17], %s4330_s6  ;;  %s979_s12 = scalar_lea.sflag [#allocation19], %s4327_s17 }
 0x249   : > { %s982_s8 = scalar_lea.vmem [#allocation18], %s4339_s9 }
 0x24a   : > { %3526 = dma.done.wait (%p4708_p0), %s979_s12, 272  }
 0x24b   : > { %3528 = vsyncadd (%p4708_p0), %s979_s12, 4294967024  ;;  %s996_s21 = scalar_lea.sflag [#allocation22], %s4327_s17 }
 0x24c   : > { %3530 = dma.done.wait (%p4708_p0), %s996_s21, 32  }
 0x24d   : > { %3532 = vsyncadd (%p4708_p0), %s996_s21, 4294967264  ;;  %s1006_s0 = scalar_lea.vmem [#allocation23], %s4330_s6  ;;  %s1012_s5 = scalar_lea.sflag [#allocation25], %s4327_s17 }
 0x24e   : > { %s1015_s23 = scalar_lea.vmem [#allocation24], %s4339_s9 }
 0x24f   : > { %3534 = dma.done.wait (%p4708_p0), %s1012_s5, 272  }
 0x250   : > { %3536 = vsyncadd (%p4708_p0), %s1012_s5, 4294967024  ;;  %s1023_s12 = scalar_lea.vmem [#allocation26], %s4330_s6  ;;  %s1029_s25 = scalar_lea.sflag [#allocation28], %s4327_s17 }
 0x251   : > { %s1032_s11 = scalar_lea.vmem [#allocation27], %s4339_s9 }
 0x252   : > { %3538 = dma.done.wait (%p4708_p0), %s1029_s25, 272  }
 0x253   : > { %3540 = vsyncadd (%p4708_p0), %s1029_s25, 4294967024  ;;  %s1040_s21 = scalar_lea.vmem [#allocation29], %s4330_s6  ;;  %p4709_p7 = pmov %p4705_p1 }
 0x254   : > { %p4710_p3 = pmov %p4705_p1 }
 0x255   : > { %3542 = dma.done.wait (%p4709_p7), [#allocation31], 32  }
 0x256   : > { %3544 = vsyncadd (%p4710_p3), [#allocation31], 4294967264  ;;  %s4711_s5 = sld [smem:[#allocation46_spill]] }
 0x25c   : > { %p2558_p6 = scmp.ne.s32.totalorder %s4711_s5, 0 }
 0x25d   : > { %v1162_v0 = vld [vmem:[#allocation3] sm:$0xff] (!%p2558_p6)  ;;  %vm1164_vm0 = vcmask (!%p2558_p6), 261120   ;;  %v1163_v1 = vld [vmem:[#allocation3 + $0x8] sm:$0xff] (!%p2558_p6) }
 0x25e   : > { %1161 = sbr.rel (%p2558_p6) target bundleno = 613 (0x265), region = 176  ;;  %1165 = vst.msk [vmem:[#allocation2] sm:$0xff] (!%p2558_p6), %vm1164_vm0, %v1162_v0  ;;  %1166 = vst.msk [vmem:[#allocation2 + $0x8] sm:$0xff] (!%p2558_p6), %vm1164_vm0, %v1163_v1 }
 0x265 PF: > { %v1167_v2 = vld [vmem:[#allocation2] sm:$0xff]  ;;  %vm1174_vm1 = vcmask 261120   ;;  %v1168_v3 = vld [vmem:[#allocation2 + $0x8] sm:$0xff]  ;;  %v3596_v17 = vmov 0.0   ;;  %vm3597_vm2 = vmmov 0   ;;  %vm1378_vm3 = vcmask 130048  }
 0x266   : > { %v1175_v4 = vsel %vm1174_vm1, %v1167_v2, 0.0  ;;  %v1178_v5 = vsel %vm1174_vm1, %v1168_v3, 0.0  ;;  %v2885_v16 = vld [vmem:[%s965_s27] sm:$0xff]   ;;  %2642 = vmatprep.subr.bf16.mxu1 %v3596_v17  ;;  %2634 = vmatprep.subr.bf16.mxu0 %v3596_v17  ;;  %v2886_v18 = vld [vmem:[%s965_s27 + $0x8] sm:$0xff]   ;;  %v1286_v19 = vpack.c.bf16 %v1168_v3, %v1167_v2  ;;  %s3598_s4 = smov 112   ;;  %vm1563_vm4 = vcmask 64512  }
 0x267   : > { %1176 = vadd.xlane.f32.xlu0 %v1175_v4  ;;  %2643 = vmatpush3.bf16.msra.mxu1 %v2885_v16  ;;  %v2887_v20 = vld [vmem:[%s948_s19] sm:$0xff]   ;;  %v2888_v21 = vld [vmem:[%s948_s19 + $0x8] sm:$0xff]   ;;  %s3599_s29 = smov 96   ;;  %vm1618_vm5 = vcmask 1043456   ;;  %s3600_s17 = smov 16  }
 0x268   : > { %2644 = vmatprep.subr.bf16.mxu1 %v3596_v17  ;;  %2646 = vmatprep.mubr.msk.bf16.mxu1 %vm3597_vm2, %v3596_v17  ;;  %v2559_v30 = vld [vmem:[%s931_s30] ss:$0 sm:$0xff]  ;;  %s4712_s30 = scalar_lea.vmem [#allocation20], %s4330_s6  ;;  %s4714_s9 = sld [smem:[#allocation46_spill]] }
 0x269   : > { %2638 = vmatprep.mubr.msk.bf16.mxu0 %vm3597_vm2, %v3596_v17  ;;  %2635 = vmatpush3.bf16.msra.mxu0 %v2887_v20  ;;  %v2560_v34 = vld [vmem:[%s939_s24] ss:$0 sm:$0xff]  ;;  %s4713_s24 = scalar_lea.vmem [#allocation21], %s4330_s6 }
 0x26a   : > { %2636 = vmatprep.subr.bf16.mxu0 %v3596_v17  ;;  %v2565_v39 = vld [vmem:[%s973_s7] ss:$0 sm:$0xff] }
 0x26b   : > { %1179 = vadd.xlane.f32.xlu0 %v1178_v5  ;;  %2645 = vmatpush3.bf16.msra.mxu1 %v2886_v18  ;;  %v2561_v54 = vld [vmem:[%s956_s3] ss:$0 sm:$0xff] }
 0x26c   : > { %2656 = vmatprep.subr.bf16.mxu1 %v3596_v17 }
 0x26d   : > { %2637 = vmatpush3.bf16.msra.mxu0 %v2888_v21 }
 0x26e   : > { %2647 = vmatmul.mubr.msk.bf16.vlgmr.msra.gmra.mrb[0].mxu1 %vm1174_vm1, %v1286_v19  ;;  %2650 = vmatprep.subr.bf16.mxu0 %v3596_v17  ;;  %p2591_p9 = scmp.ne.s32.totalorder %s4714_s9, 1 }
 0x26f   : > { %2658 = vmatprep.mubr.msk.bf16.mxu1 %vm3597_vm2, %v3596_v17 }
 0x2f4   : > { %v1177_v6 = vpop.xlane.xlu0 %1176 }
 0x2f5   : > { %v1182_v7 = vmul.f32 0.03125, %v1177_v6 }
 0x2f7   : > { %v1184_v8 = vsub.f32 %v1167_v2, %v1182_v7 }
 0x2f8   : > { %v1180_v9 = vpop.xlane.xlu0 %1179 }
 0x2f9   : > { %v1183_v10 = vmul.f32 0.03125, %v1180_v9  ;;  %v1186_v11 = vmul.f32 %v1184_v8, %v1184_v8  ;;  %v1171_v9 = vld [vmem:[#allocation8] sm:$0xff] }
 0x2fb   : > { %v1185_v12 = vsub.f32 %v1168_v3, %v1183_v10  ;;  %v1188_v13 = vsel %vm1174_vm1, %v1186_v11, 0.0 }
 0x2fc   : > { %1189 = vadd.xlane.f32.xlu1 %v1188_v13 }
 0x2fd   : > { %v1187_v14 = vmul.f32 %v1185_v12, %v1185_v12 }
 0x2ff   : > { %v1191_v15 = vsel %vm1174_vm1, %v1187_v14, 0.0 }
 0x300   : > { %1192 = vadd.xlane.f32.xlu1 %v1191_v15 }
 0x341   : > { %v1347_v40 = vpop.f32.mrb[0].mxu1 }
 0x342   : > { %v1348_v41 = vadd.f32 %v2565_v39, %v1347_v40  ;;  %v2648_v42 = vpop.f32.mrb[1].mxu1 }
 0x343   : > { %v1350_v43 = vpop.f32.mrb[2].mxu1 }
 0x344   : > { %v4429_v44 = vpack.c.bf16 %v1348_v41, %v1348_v41  ;;  %v1351_v45 = vadd.f32 %v2565_v39, %v1350_v43  ;;  %v2649_v46 = vpop.f32.mrb[3].mxu1 }
 0x346   : > { %v2868_v47 = vpack.i.bf16 %v1351_v45, %v1348_v41  ;;  %v4431_v48 = vpack.c.bf16 %v1351_v45, %v1351_v45  ;;  %v1383_v49 = vsel %vm1378_vm3, %v4429_v44, 0 }
 0x348   : > { %2869 = vrot.lane.b32.xlu0 %v2868_v47, %s3598_s4  ;;  %v1429_v50 = vsel %vm1378_vm3, %v4431_v48, 0 }
 0x349   : > { %2657 = vmatpush3.bf16.xpose.msra.mxu1 %v1429_v50 }
 0x34a   : > { %2668 = vmatprep.subr.bf16.mxu1 %v3596_v17 }
 0x389   : > { %v1190_v22 = vpop.xlane.xlu1 %1189 }
 0x38a   : > { %v1194_v23 = vmul.f32 0.03125, %v1190_v22 }
 0x38c   : > { %v1196_v24 = vadd.f32 1e-08, %v1194_v23 }
 0x38d   : > { %v1193_v25 = vpop.xlane.xlu1 %1192 }
 0x38e   : > { %2895 = vrsqrt.f32 %v1196_v24  ;;  %v1195_v26 = vmul.f32 0.03125, %v1193_v25 }
 0x390   : > { %v1197_v27 = vadd.f32 1e-08, %v1195_v26 }
 0x392   : > { %2897 = vrsqrt.f32 %v1197_v27 }
 0x398   : > { %v2896_v28 = vpop.eup %2895 }
 0x399   : > { %v1200_v29 = vmul.f32 %v2896_v28, %v1184_v8 }
 0x39b   : > { %v1208_v33 = vmul.f32 %v2559_v30, %v1200_v29 }
 0x39c   : > { %v2898_v31 = vpop.eup %2897 }
 0x39d   : > { %v1201_v32 = vmul.f32 %v2898_v31, %v1185_v12  ;;  %v4418_v36 = vadd.f32 %v2560_v34, %v1208_v33 }
 0x39f   : > { %v1209_v35 = vmul.f32 %v2559_v30, %v1201_v32 }
 0x3a1   : > { %v4420_v37 = vadd.f32 %v2560_v34, %v1209_v35 }
 0x3a3   : > { %v1218_v38 = vpack.c.bf16 %v4420_v37, %v4418_v36 }
 0x3a5   : > { %2639 = vmatmul.mubr.msk.bf16.vlgmr.msra.gmra.mrb[0].mxu0 %vm1174_vm1, %v1218_v38 }
 0x3a6   : > { %2652 = vmatprep.mubr.msk.bf16.mxu0 %vm3597_vm2, %v3596_v17  ;;  %2651 = vmatpush3.bf16.xpose.msra.mxu0 %v1383_v49 }
 0x3a7   : > { %2662 = vmatprep.subr.bf16.mxu0 %v3596_v17 }
 0x3ba   : > { %v2870_v51 = vpop.permute.xlu0 %2869 }
 0x3bb   : > { %v2871_v52 = vunpack.i.l.bf16 %v2870_v51  ;;  %v2872_v53 = vunpack.i.h.bf16 %v2870_v51 }
 0x3bd   : > { %v4441_v55 = vpack.c.bf16 %v2871_v52, %v2871_v52  ;;  %v4443_v59 = vpack.c.bf16 %v2872_v53, %v2872_v53 }
 0x3bf   : > { %v1475_v0 = vsel %vm1378_vm3, %v4441_v55, 0  ;;  %v1521_v3 = vsel %vm1378_vm3, %v4443_v59, 0 }
 0x478   : > { %v1279_v56 = vpop.f32.mrb[0].mxu0 }
 0x479   : > { %v1280_v57 = vadd.f32 %v2561_v54, %v1279_v56  ;;  %v2640_v58 = vpop.f32.mrb[1].mxu0 }
 0x47a   : > { %v1282_v60 = vpop.f32.mrb[2].mxu0 }
 0x47b   : > { %v1362_v61 = vpack.c.bf16 %v1280_v57, %v1280_v57  ;;  %v1283_v62 = vadd.f32 %v2561_v54, %v1282_v60  ;;  %v2641_v63 = vpop.f32.mrb[3].mxu0 }
 0x47d   : > { %v2873_v1 = vpack.i.bf16 %v1283_v62, %v1280_v57  ;;  %v1363_v2 = vpack.c.bf16 %v1283_v62, %v1283_v62  ;;  %2653 = vmatmul.mubr.msk.bf16.vlgmr.msra.gmra.mrb[4].mxu0 %vm1378_vm3, %v1362_v61 }
 0x47e   : > { %2663 = vmatpush3.bf16.xpose.msra.mxu0 %v1475_v0  ;;  %2664 = vmatprep.mubr.msk.bf16.mxu0 %vm3597_vm2, %v3596_v17 }
 0x47f   : > { %2874 = vrot.lane.b32.xlu1 %v2873_v1, %s3598_s4  ;;  %2659 = vmatmul.mubr.msk.bf16.vlgmr.msra.gmra.mrb[4].mxu1 %vm1378_vm3, %v1363_v2 }
 0x480   : > { %2669 = vmatpush3.bf16.xpose.msra.mxu1 %v1521_v3  ;;  %2670 = vmatprep.mubr.msk.bf16.mxu1 %vm3597_vm2, %v3596_v17 }
 0x481   : > { %2680 = vmatprep.subr.bf16.mxu1 %v3596_v17  ;;  %2674 = vmatprep.subr.bf16.mxu0 %v3596_v17 }
 0x4f1   : > { %v2875_v4 = vpop.permute.xlu1 %2874 }
 0x4f2   : > { %v2877_v5 = vunpack.i.h.bf16 %v2875_v4  ;;  %v2876_v6 = vunpack.i.l.bf16 %v2875_v4 }
 0x4f4   : > { %v1365_v7 = vpack.c.bf16 %v2877_v5, %v2877_v5  ;;  %v1364_v8 = vpack.c.bf16 %v2876_v6, %v2876_v6 }
 0x4f6   : > { %2665 = vmatmul.mubr.msk.bf16.vlgmr.msra.gmra.mrb[8].mxu0 %vm1378_vm3, %v1364_v8  ;;  %2671 = vmatmul.mubr.msk.bf16.vlgmr.msra.gmra.mrb[8].mxu1 %vm1378_vm3, %v1365_v7 }
 0x4f7   : > { %2682 = vmatprep.mubr.msk.bf16.mxu1 %vm3597_vm2, %v3596_v17  ;;  %2676 = vmatprep.mubr.msk.bf16.mxu0 %vm3597_vm2, %v3596_v17 }
 0x550   : > { %v1419_v10 = vpop.f32.mrb[4].mxu0 }
 0x551   : > { %v1420_v11 = vadd.f32 %v1419_v10, %v1171_v9  ;;  %v2654_v12 = vpop.f32.mrb[5].mxu0 }
 0x552   : > { %v1422_v13 = vpop.f32.mrb[6].mxu0  ;;  %v1465_v14 = vpop.f32.mrb[4].mxu1 }
 0x553   : > { %v1466_v15 = vadd.f32 %v1465_v14, %v1171_v9  ;;  %v2655_v16 = vpop.f32.mrb[7].mxu0  ;;  %v2660_v18 = vpop.f32.mrb[5].mxu1  ;;  %v1564_v19 = vsel %vm1563_vm4, %v1420_v11, -inf }
 0x554   : > { %v1468_v20 = vpop.f32.mrb[6].mxu1  ;;  %1565 = vmax.xlane.f32.xlu1 %v1564_v19  ;;  %v2889_v18 = vld [vmem:[%s982_s8] sm:$0xff]  }
 0x555   : > { %v2661_v21 = vpop.f32.mrb[7].mxu1  ;;  %v1567_v22 = vsel %vm1563_vm4, %v1466_v15, -inf }
 0x556   : > { %1568 = vmax.xlane.f32.xlu0 %v1567_v22 }
 0x5c9   : > { %v1511_v23 = vpop.f32.mrb[8].mxu0  ;;  %v1557_v24 = vpop.f32.mrb[8].mxu1 }
 0x5ca   : > { %v1512_v25 = vadd.f32 %v1511_v23, %v1171_v9  ;;  %v1558_v26 = vadd.f32 %v1557_v24, %v1171_v9  ;;  %v2666_v27 = vpop.f32.mrb[9].mxu0  ;;  %v2672_v28 = vpop.f32.mrb[9].mxu1  ;;  %v2890_v23 = vld [vmem:[%s982_s8 + $0x8] sm:$0xff]  }
 0x5cb   : > { %v1514_v29 = vpop.f32.mrb[10].mxu0  ;;  %v1560_v30 = vpop.f32.mrb[10].mxu1 }
 0x5cc   : > { %v2667_v31 = vpop.f32.mrb[11].mxu0  ;;  %v2673_v32 = vpop.f32.mrb[11].mxu1  ;;  %v1573_v33 = vsel %vm1563_vm4, %v1558_v26, -inf  ;;  %v1570_v34 = vsel %vm1563_vm4, %v1512_v25, -inf }
 0x5cd   : > { %1574 = vmax.xlane.f32.xlu1 %v1573_v33  ;;  %1571 = vmax.xlane.f32.xlu0 %v1570_v34 }
 0x5e1   : > { %v1566_v35 = vpop.xlane.xlu1 %1565 }
 0x5e2   : > { %v1576_v38 = vsub.f32 %v1420_v11, %v1566_v35 }
 0x5e3   : > { %v1569_v39 = vpop.xlane.xlu0 %1568 }
 0x5e4   : > { %v1580_v40 = vmul.f32 1.442695, %v1576_v38  ;;  %v1577_v41 = vsub.f32 %v1466_v15, %v1569_v39 }
 0x5e6   : > { %2899 = vpow2.f32 %v1580_v40  ;;  %v1582_v42 = vmul.f32 1.442695, %v1577_v41 }
 0x5e8   : > { %2901 = vpow2.f32 %v1582_v42 }
 0x5f0   : > { %v2900_v43 = vpop.eup %2899 }
 0x5f1   : > { %v1588_v45 = vsel %vm1563_vm4, %v2900_v43, 0.0 }
 0x5f2   : > { %v2902_v46 = vpop.eup %2901  ;;  %1589 = vadd.xlane.f32.xlu0 %v1588_v45 }
 0x5f3   : > { %v1591_v47 = vsel %vm1563_vm4, %v2902_v46, 0.0 }
 0x5f4   : > { %1592 = vadd.xlane.f32.xlu1 %v1591_v47 }
 0x605   : > { %1663 = vrot.lane.b32.xlu1 %v4431_v48, %s3599_s29 }
 0x609   : > { %1712 = vrot.lane.b32.xlu1 %v4441_v55, %s3599_s29 }
 0x65a   : > { %v1575_v49 = vpop.xlane.xlu1 %1574  ;;  %v1572_v50 = vpop.xlane.xlu0 %1571 }
 0x65b   : > { %v1579_v51 = vsub.f32 %v1558_v26, %v1575_v49  ;;  %v1578_v52 = vsub.f32 %v1512_v25, %v1572_v50 }
 0x65d   : > { %v1586_v53 = vmul.f32 1.442695, %v1579_v51  ;;  %v1584_v54 = vmul.f32 1.442695, %v1578_v52 }
 0x65f   : > { %2903 = vpow2.f32 %v1586_v53 }
 0x660   : > { %2905 = vpow2.f32 %v1584_v54 }
 0x669   : > { %v2904_v56 = vpop.eup %2903 }
 0x66a   : > { %v2906_v57 = vpop.eup %2905  ;;  %v1597_v58 = vsel %vm1563_vm4, %v2904_v56, 0.0 }
 0x66b   : > { %1598 = vadd.xlane.f32.xlu1 %v1597_v58  ;;  %v1594_v60 = vsel %vm1563_vm4, %v2906_v57, 0.0 }
 0x66c   : > { %1595 = vadd.xlane.f32.xlu0 %v1594_v60 }
 0x67c   : > { %1761 = vrot.lane.b32.xlu1 %v4443_v59, %s3599_s29 }
 0x67f   : > { %v1590_v59 = vpop.xlane.xlu0 %1589 }
 0x681   : > { %v1593_v48 = vpop.xlane.xlu1 %1592 }
 0x682   : > { %2907 = vrcp.f32 %v1593_v48  ;;  %1613 = vrot.lane.b32.xlu0 %v4429_v44, %s3599_s29 }
 0x683   : > { %2909 = vrcp.f32 %v1590_v59 }
 0x685   : > { %v1664_v55 = vpop.permute.xlu1 %1663 }
 0x686   : > { %v1669_v61 = vsel %vm1618_vm5, %v1664_v55, 0 }
 0x687   : > { %2681 = vmatpush3.bf16.msra.mxu1 %v1669_v61 }
 0x688   : > { %2692 = vmatprep.subr.bf16.mxu1 %v3596_v17 }
 0x689   : > { %v1713_v1 = vpop.permute.xlu1 %1712 }
 0x68a   : > { %v1718_v10 = vsel %vm1618_vm5, %v1713_v1, 0 }
 0x68c   : > { %v2908_v62 = vpop.eup %2907 }
 0x68d   : > { %v1605_v63 = vmul.f32 %v2908_v62, %v2902_v46  ;;  %v2910_v44 = vpop.eup %2909  ;;  %v2577_v46 = vld [vmem:[%s4712_s30] ss:$0 sm:$0xff] }
 0x68e   : > { %v1604_v4 = vmul.f32 %v2910_v44, %v2900_v43 }
 0x68f   : > { %v1609_v0 = vpack.c.bf16 %v1605_v63, %v1605_v63 }
 0x690   : > { %v1608_v9 = vpack.c.bf16 %v1604_v4, %v1604_v4 }
 0x691   : > { %2683 = vmatmul.mubr.msk.bf16.vlgmr.msra.gmra.mrb[12].mxu1 %vm1563_vm4, %v1609_v0 }
 0x692   : > { %2694 = vmatprep.mubr.msk.bf16.mxu1 %vm3597_vm2, %v3596_v17 }
 0x6f8   : > { %v1599_v2 = vpop.xlane.xlu1 %1598 }
 0x6f9   : > { %2911 = vrcp.f32 %v1599_v2  ;;  %v1596_v3 = vpop.xlane.xlu0 %1595  ;;  %v2892_v2 = vld [vmem:[%s1015_s23 + $0x8] sm:$0xff]  }
 0x6fa   : > { %2913 = vrcp.f32 %v1596_v3 }
 0x6fc   : > { %v1762_v5 = vpop.permute.xlu1 %1761 }
 0x6fd   : > { %v1767_v6 = vsel %vm1618_vm5, %v1762_v5, 0  ;;  %v1614_v7 = vpop.permute.xlu0 %1613 }
 0x6fe   : > { %v1620_v8 = vsel %vm1618_vm5, %v1614_v7, 0  ;;  %2693 = vmatpush3.bf16.msra.mxu1 %v1767_v6 }
 0x6ff   : > { %2675 = vmatpush3.bf16.msra.mxu0 %v1620_v8  ;;  %2706 = vmatprep.subr.bf16.mxu1 %v3596_v17 }
 0x700   : > { %2686 = vmatprep.subr.bf16.mxu0 %v3596_v17 }
 0x702   : > { %2677 = vmatmul.mubr.msk.bf16.vlgmr.msra.gmra.mrb[12].mxu0 %vm1563_vm4, %v1608_v9 }
 0x703   : > { %v2912_v11 = vpop.eup %2911  ;;  %2687 = vmatpush3.bf16.msra.mxu0 %v1718_v10  ;;  %2688 = vmatprep.mubr.msk.bf16.mxu0 %vm3597_vm2, %v3596_v17  ;;  %v2581_v10 = vld [vmem:[%s4713_s24] ss:$0 sm:$0xff] }
 0x704   : > { %v2914_v12 = vpop.eup %2913  ;;  %v1607_v13 = vmul.f32 %v2912_v11, %v2904_v56  ;;  %2698 = vmatprep.subr.bf16.mxu0 %v3596_v17 }
 0x705   : > { %v1606_v14 = vmul.f32 %v2914_v12, %v2906_v57 }
 0x706   : > { %v1611_v15 = vpack.c.bf16 %v1607_v13, %v1607_v13 }
 0x707   : > { %v1610_v16 = vpack.c.bf16 %v1606_v14, %v1606_v14  ;;  %v2582_v14 = vld [vmem:[%s1006_s0] ss:$0 sm:$0xff] }
 0x708   : > { %2695 = vmatmul.mubr.msk.bf16.vlgmr.msra.gmra.mrb[16].mxu1 %vm1563_vm4, %v1611_v15 }
 0x709   : > { %2710 = vmatprep.mubr.msk.bf16.mxu1 %vm3597_vm2, %v3596_v17 }
 0x70a   : > { %2689 = vmatmul.mubr.msk.bf16.vlgmr.msra.gmra.mrb[16].mxu0 %vm1563_vm4, %v1610_v16 }
 0x70b   : > { %2702 = vmatprep.mubr.msk.bf16.mxu0 %vm3597_vm2, %v3596_v17  ;;  %2699 = vmatpush3.bf16.msra.mxu0 %v2889_v18 }
 0x70c   : > { %2700 = vmatprep.subr.bf16.mxu0 %v3596_v17 }
 0x70f   : > { %2701 = vmatpush3.bf16.msra.mxu0 %v2890_v23  ;;  %v1170_v23 = vld [vmem:[#allocation6 + $0x8] sm:$0xff] }
 0x710   : > { %2714 = vmatprep.subr.bf16.mxu0 %v3596_v17 }
 0x764   : > { %v1705_v19 = vpop.f32.mrb[12].mxu1 }
 0x765   : > { %v2684_v20 = vpop.f32.mrb[13].mxu1 }
 0x766   : > { %v1708_v21 = vpop.f32.mrb[14].mxu1  ;;  %v2893_v20 = vld [vmem:[%s1032_s11] sm:$0xff]  }
 0x767   : > { %v2685_v22 = vpop.f32.mrb[15].mxu1  ;;  %v2894_v21 = vld [vmem:[%s1032_s11 + $0x8] sm:$0xff]  }
 0x768   : > { %v1169_v22 = vld [vmem:[#allocation6] sm:$0xff] }
 0x7d5   : > { %v1656_v24 = vpop.f32.mrb[12].mxu0 }
 0x7d6   : > { %v2678_v25 = vpop.f32.mrb[13].mxu0 }
 0x7d7   : > { %v1659_v26 = vpop.f32.mrb[14].mxu0  ;;  %v2583_v25 = vld [vmem:[%s1023_s12] ss:$0 sm:$0xff] }
 0x7d8   : > { %v2679_v27 = vpop.f32.mrb[15].mxu0 }
 0x7db   : > { %v1803_v28 = vpop.f32.mrb[16].mxu1 }
 0x7dc   : > { %v2696_v29 = vpop.f32.mrb[17].mxu1 }
 0x7dd   : > { %v1754_v30 = vpop.f32.mrb[16].mxu0  ;;  %v1806_v31 = vpop.f32.mrb[18].mxu1 }
 0x7de   : > { %v2878_v32 = vpack.i.bf16 %v1803_v28, %v1754_v30  ;;  %v2690_v33 = vpop.f32.mrb[17].mxu0  ;;  %v2697_v34 = vpop.f32.mrb[19].mxu1 }
 0x7df   : > { %v1757_v35 = vpop.f32.mrb[18].mxu0  ;;  %v2587_v34 = vld [vmem:[%s1040_s21] ss:$0 sm:$0xff] }
 0x7e0   : > { %2879 = vrot.lane.b32.xlu0 %v2878_v32, %s3600_s17  ;;  %v2691_v38 = vpop.f32.mrb[19].mxu0 }
 0x852   : > { %v2880_v39 = vpop.permute.xlu0 %2879 }
 0x853   : > { %v2882_v40 = vunpack.i.h.bf16 %v2880_v39  ;;  %v2881_v41 = vunpack.i.l.bf16 %v2880_v39 }
 0x855   : > { %v1818_v42 = vsel %vm1378_vm3, %v1705_v19, %v2882_v40  ;;  %v1817_v43 = vsel %vm1378_vm3, %v1656_v24, %v2881_v41  ;;  %v3601_v24 = vmov 0  }
 0x856   : > { %v1819_v45 = vpack.c.bf16 %v1818_v42, %v1817_v43  ;;  %2883 = vset.pattern.permute.xlu1 %v3601_v24  ;;  %2884 = vset.pattern.permute.xlu0 %v3601_v24 }
 0x858   : > { %2703 = vmatmul.mubr.msk.bf16.vlgmr.msra.gmra.mrb[20].mxu0 %vm1174_vm1, %v1819_v45 }
 0x859   : > { %2718 = vmatprep.mubr.msk.bf16.mxu0 %vm3597_vm2, %v3596_v17  ;;  %2715 = vmatpush3.bf16.msra.mxu0 %v2893_v20 }
 0x85a   : > { %2716 = vmatprep.subr.bf16.mxu0 %v3596_v17 }
 0x85d   : > { %2717 = vmatpush3.bf16.msra.mxu0 %v2894_v21 }
 0x92b   : > { %v1880_v47 = vpop.f32.mrb[20].mxu0 }
 0x92c   : > { %v1881_v49 = vadd.f32 %v2577_v46, %v1880_v47  ;;  %v2704_v50 = vpop.f32.mrb[21].mxu0 }
 0x92d   : > { %v1883_v51 = vpop.f32.mrb[22].mxu0 }
 0x92e   : > { %v1884_v52 = vadd.f32 %v2577_v46, %v1883_v51  ;;  %v2705_v53 = vpop.f32.mrb[23].mxu0  ;;  %v1887_v54 = vadd.f32 %v1881_v49, %v4418_v36 }
 0x930   : > { %v1891_v56 = vsel %vm1174_vm1, %v1887_v54, 0.0  ;;  %v1888_v57 = vadd.f32 %v1884_v52, %v4420_v37  ;;  %v2891_v37 = vld [vmem:[%s1015_s23] sm:$0xff]  }
 0x931   : > { %1892 = vadd.xlane.f32.xlu1 %v1891_v56  ;;  %2707 = vmatpush3.bf16.msra.mxu1 %v2891_v37 }
 0x932   : > { %v1894_v58 = vsel %vm1174_vm1, %v1888_v57, 0.0  ;;  %2708 = vmatprep.subr.bf16.mxu1 %v3596_v17 }
 0x933   : > { %1895 = vadd.xlane.f32.xlu0 %v1894_v58 }
 0x935   : > { %2709 = vmatpush3.bf16.msra.mxu1 %v2892_v2 }
 0x942   : > { %2075 = vperm.xlu1 %2883, %v1169_v22  }
 0x9be   : > { %v1893_v60 = vpop.xlane.xlu1 %1892 }
 0x9bf   : > { %v1897_v48 = vmul.f32 0.03125, %v1893_v60 }
 0x9c0   : > { %v1896_v55 = vpop.xlane.xlu0 %1895 }
 0x9c1   : > { %v1899_v61 = vsub.f32 %v1887_v54, %v1897_v48  ;;  %v1898_v62 = vmul.f32 0.03125, %v1896_v55 }
 0x9c2   : > { %v2076_v41 = vpop.permute.xlu1 %2075 }
 0x9c3   : > { %v1900_v63 = vsub.f32 %v1888_v57, %v1898_v62  ;;  %v1901_v0 = vmul.f32 %v1899_v61, %v1899_v61 }
 0x9c5   : > { %v1903_v59 = vsel %vm1174_vm1, %v1901_v0, 0.0  ;;  %v1902_v36 = vmul.f32 %v1900_v63, %v1900_v63 }
 0x9c6   : > { %1904 = vadd.xlane.f32.xlu0 %v1903_v59 }
 0x9c7   : > { %v1906_v1 = vsel %vm1174_vm1, %v1902_v36, 0.0 }
 0x9ca   : > { %1907 = vadd.xlane.f32.xlu0 %v1906_v1 }
 0x9e0   : > { %2080 = vperm.xlu0 %2884, %v1170_v23  }
 0xa53   : > { %v1905_v44 = vpop.xlane.xlu0 %1904 }
 0xa54   : > { %v1909_v3 = vmul.f32 0.03125, %v1905_v44  ;;  %v2592_v44 = vld [vmem:[#allocation30] ss:$0 sm:$0xff] (!%p2591_p9) }
 0xa56   : > { %v1911_v4 = vadd.f32 1e-08, %v1909_v3 }
 0xa57   : > { %v1908_v5 = vpop.xlane.xlu0 %1907 }
 0xa58   : > { %2915 = vrsqrt.f32 %v1911_v4  ;;  %v1910_v6 = vmul.f32 0.03125, %v1908_v5  ;;  %v2593_v4 = vld [vmem:[#allocation32] ss:$0 sm:$0xff] (!%p2591_p9) }
 0xa5a   : > { %v1912_v7 = vadd.f32 1e-08, %v1910_v6 }
 0xa5c   : > { %2917 = vrsqrt.f32 %v1912_v7 }
 0xa5f   : > { %v2081_v46 = vpop.permute.xlu0 %2080 }
 0xa62   : > { %v2916_v8 = vpop.eup %2915 }
 0xa63   : > { %v1915_v9 = vmul.f32 %v2916_v8, %v1899_v61 }
 0xa65   : > { %v1923_v12 = vmul.f32 %v2581_v10, %v1915_v9 }
 0xa66   : > { %v2918_v11 = vpop.eup %2917 }
 0xa67   : > { %v1916_v13 = vmul.f32 %v2918_v11, %v1900_v63  ;;  %v1931_v16 = vadd.f32 %v2582_v14, %v1923_v12 }
 0xa69   : > { %v1924_v15 = vmul.f32 %v2581_v10, %v1916_v13 }
 0xa6b   : > { %v1932_v18 = vadd.f32 %v2582_v14, %v1924_v15 }
 0xa6d   : > { %v1933_v19 = vpack.c.bf16 %v1932_v18, %v1931_v16 }
 0xa6f   : > { %2711 = vmatmul.mubr.msk.bf16.vlgmr.msra.gmra.mrb[20].mxu1 %vm1174_vm1, %v1933_v19 }
 0xb42   : > { %v1994_v26 = vpop.f32.mrb[20].mxu1 }
 0xb43   : > { %v1995_v27 = vadd.f32 %v2583_v25, %v1994_v26  ;;  %v2712_v28 = vpop.f32.mrb[21].mxu1 }
 0xb44   : > { %v1997_v29 = vpop.f32.mrb[22].mxu1 }
 0xb45   : > { %v1998_v30 = vadd.f32 %v2583_v25, %v1997_v29  ;;  %v2713_v31 = vpop.f32.mrb[23].mxu1  ;;  %v2001_v17 = vmax.f32 %v1995_v27, 0.0 }
 0xb47   : > { %v2002_v32 = vmax.f32 %v1998_v30, 0.0 }
 0xb49   : > { %v2003_v33 = vpack.c.bf16 %v2002_v32, %v2001_v17 }
 0xb4b   : > { %2719 = vmatmul.mubr.msk.bf16.vlgmr.msra.gmra.mrb[24].mxu0 %vm1174_vm1, %v2003_v33 }
 0xc1e   : > { %v2064_v35 = vpop.f32.mrb[24].mxu0 }
 0xc1f   : > { %v2065_v38 = vadd.f32 %v2587_v34, %v2064_v35  ;;  %v2720_v39 = vpop.f32.mrb[25].mxu0 }
 0xc20   : > { %v2067_v40 = vpop.f32.mrb[26].mxu0 }
 0xc21   : > { %v2068_v42 = vadd.f32 %v2587_v34, %v2067_v40  ;;  %v2721_v43 = vpop.f32.mrb[27].mxu0  ;;  %v2071_v45 = vadd.f32 %v2065_v38, %v1931_v16  ;;  %2090 = sbr.rel (%p2591_p9) target bundleno = 3427 (0xd63), region = 180 }
 0xc23   : > { %v2083_v47 = vmul.f32 %v2076_v41, %v2071_v45  ;;  %v2072_v49 = vadd.f32 %v2068_v42, %v1932_v18 }
 0xc25   : > { %2085 = vst.msk [vmem:[#allocation2] sm:$0xff] %vm1174_vm1, %v2083_v47  ;;  %v2084_v50 = vmul.f32 %v2081_v46, %v2072_v49  ;;  %v2093_v51 = vsel (!%p2591_p9), %vm1174_vm1, %v2083_v47, 0.0 }
 0xc26   : > { %2094 = vadd.xlane.f32.xlu0 (!%p2591_p9), %v2093_v51 }
 0xc27   : > { %2086 = vst.msk [vmem:[#allocation2 + $0x8] sm:$0xff] %vm1174_vm1, %v2084_v50  ;;  %v2096_v52 = vsel (!%p2591_p9), %vm1174_vm1, %v2084_v50, 0.0 }
 0xc2a   : > { %2097 = vadd.xlane.f32.xlu0 %v2096_v52 }
 0xcb3   : > { %v2095_v53 = vpop.xlane.xlu0 %2094 }
 0xcb4   : > { %v2099_v54 = vmul.f32 0.03125, %v2095_v53 }
 0xcb6   : > { %v2101_v56 = vsub.f32 %v2083_v47, %v2099_v54 }
 0xcb7   : > { %v2098_v57 = vpop.xlane.xlu0 %2097 }
 0xcb8   : > { %v2100_v58 = vmul.f32 0.03125, %v2098_v57  ;;  %v2103_v60 = vmul.f32 %v2101_v56, %v2101_v56 }
 0xcba   : > { %v2102_v48 = vsub.f32 %v2084_v50, %v2100_v58  ;;  %v2105_v55 = vsel %vm1174_vm1, %v2103_v60, 0.0 }
 0xcbb   : > { %2106 = vadd.xlane.f32.xlu1 %v2105_v55 }
 0xcbc   : > { %v2104_v61 = vmul.f32 %v2102_v48, %v2102_v48 }
 0xcbe   : > { %v2108_v62 = vsel %vm1174_vm1, %v2104_v61, 0.0 }
 0xcbf   : > { %2109 = vadd.xlane.f32.xlu1 %v2108_v62 }
 0xd48   : > { %v2107_v63 = vpop.xlane.xlu1 %2106 }
 0xd49   : > { %v2111_v0 = vmul.f32 0.03125, %v2107_v63 }
 0xd4b   : > { %v2113_v59 = vadd.f32 1e-08, %v2111_v0 }
 0xd4c   : > { %v2110_v36 = vpop.xlane.xlu1 %2109 }
 0xd4d   : > { %2919 = vrsqrt.f32 %v2113_v59  ;;  %v2112_v1 = vmul.f32 0.03125, %v2110_v36 }
 0xd4f   : > { %v2114_v37 = vadd.f32 1e-08, %v2112_v1 }
 0xd51   : > { %2921 = vrsqrt.f32 %v2114_v37 }
 0xd57   : > { %v2920_v2 = vpop.eup %2919 }
 0xd58   : > { %v2117_v3 = vmul.f32 %v2920_v2, %v2101_v56 }
 0xd5a   : > { %v2125_v5 = vmul.f32 %v2592_v44, %v2117_v3 }
 0xd5b   : > { %v2922_v6 = vpop.eup %2921 }
 0xd5c   : > { %v2133_v7 = vadd.f32 %v2593_v4, %v2125_v5  ;;  %v2118_v8 = vmul.f32 %v2922_v6, %v2102_v48 }
 0xd5e   : > { %2135 = vst.msk [vmem:[#allocation33] sm:$0xff] %vm1174_vm1, %v2133_v7  ;;  %v2126_v9 = vmul.f32 %v2592_v44, %v2118_v8 }
 0xd60   : > { %v2134_v10 = vadd.f32 %v2593_v4, %v2126_v9 }
 0xd62   : > { %2136 = vst.msk [vmem:[#allocation33 + $0x8] sm:$0xff] %vm1174_vm1, %v2134_v10 }
 0xd63 PF: > { %s4715_s6 = sld [smem:[#allocation47_spill]]  ;;  %s3602_s19 = smov [#allocation33]  }
 0xd64   : > { %s2146_s3 = sshll.u32 %s3602_s19, 4  ;;  %s2147_s3 = int_to_ptr.vmem [resolvable:$true] %s2146_s3 }
 0xd65   : > { %s3455_s27 = scalar_lea.vmem %s2147_s3, 256  ;;  %p3462_p8 = scmp.lt.s32.totalorder %s2147_s3, %s2147_s3 }
 0xd66   : > { %p3456_p11 = scmp.ne.s32.totalorder %s2147_s3, %s3455_s27  ;;  %p3463_p10 = scmp.lt.s32.totalorder %s3455_s27, %s3455_s27 }
 0xd68   : > { %p3464_p13 = por %p3463_p10, %p3462_p8 }
 0xd69   : > { %p2800_p5 = scmp.eq.s32.totalorder %s4715_s6, 1 }
 0xd6b   : > { %p3457_p12 = pnand %p3456_p11, %p2800_p5 }
 0xd6d   : > { %p3458_p2 = pneg %p3457_p12 }
 0xd6f   : > { %p3465_p4 = pnand %p3464_p13, %p3458_p2 }
 0xd71   : > { %3468 = shalt.err (!%p3465_p4)
}
 0xd72   : > { %s4716_s11 = sld [smem:[#allocation68_spill]] }
 0xd78   : > { %s3469_s25 = scalar_lea.hbm %s4716_s11, 256 }
 0xd79   : > { %p3470_p1 = scmp.ne.s32.totalorder %s4716_s11, %s3469_s25  ;;  %p3475_p3 = scmp.lt.u32.totalorder %s3469_s25, %s4716_s11 }
 0xd7b   : > { %p3471_p0 = pnand %p3470_p1, %p2800_p5 }
 0xd7d   : > { %p3472_p7 = pneg %p3471_p0 }
 0xd7f   : > { %p3477_p6 = pnand %p3475_p3, %p3472_p7 }
 0xd81   : > { %3480 = shalt.err (!%p3477_p6)
}
 0xd82   : > { %s3603_s5 = smov 128   ;;  %s3604_s4 = smov 8  }
 0xd83   : > { %2771 = dma.vmem_to_hbm [thread:$0]  (%p2800_p5), %s2147_s3, 256, %s4716_s11, [#allocation5], %s3603_s5, %s3603_s5, %s3604_s4  }
 0xd84   : > { %3546 = dma.done.wait (%p2800_p5), [#allocation5], 256  }
 0xd85   : > { %3548 = vsyncadd (%p2800_p5), [#allocation5], 4294967040 }
 0xd86 PF: > { %s54_s22 = sadd.s32 1, %s3571_s22   ;;  %s4717_s0 = sld [smem:[#allocation45_spill]] }
 0xd87   : > { %p51_p9 = scmp.ge.s32.totalorder %s54_s22, 4   ;;  %s4718_s24 = sld [smem:[#allocation50_spill]] }
 0xd88   : > { %s4719_s9 = sld [smem:[#allocation48_spill]]  ;;  %s4720_s30 = smov %s3559_s20 }
 0xd89   : > { %s4722_s21 = smov %s3567_s1  ;;  %53 = sbr.rel (!%p51_p9) target bundleno = 38 (0x26), region = 320 }
 0xd8d   : > { %s4721_s20 = smov %s4718_s24 }
 0xd8e   : > { %s4723_s1 = smov %s4719_s9 }
 0xd90   :  { %2162 = vsyncpa [#allocation4], 1 }
 0xd91   :  { %2164 = vsyncpa [#allocation4 + $0x1], 1 }
 0xd92   :  { %2165 = vsyncpa [#allocation7], 1 }
 0xd93   :  { %2166 = vsyncpa [#allocation10], 1 }
 0xd94   :  { %2168 = vsyncpa [#allocation10 + $0x1], 1 }
 0xd95   :  { %2169 = vsyncpa [#allocation13], 1 }
 0xd96   :  { %2171 = vsyncpa [#allocation13 + $0x1], 1 }
 0xd97   :  { %2172 = vsyncpa [#allocation16], 1 }
 0xd98   :  { %2174 = vsyncpa [#allocation16 + $0x1], 1 }
 0xd99   :  { %2175 = vsyncpa [#allocation19], 1 }
 0xd9a   :  { %2177 = vsyncpa [#allocation19 + $0x1], 1 }
 0xd9b   :  { %2178 = vsyncpa [#allocation22], 1 }
 0xd9c   :  { %2180 = vsyncpa [#allocation22 + $0x1], 1 }
 0xd9d   :  { %2181 = vsyncpa [#allocation25], 1 }
 0xd9e   :  { %2183 = vsyncpa [#allocation25 + $0x1], 1 }
 0xd9f   :  { %2184 = vsyncpa [#allocation28], 1 }
 0xda0   :  { %2186 = vsyncpa [#allocation28 + $0x1], 1 }
 0xda1   :  { %2187 = vsyncpa [#allocation31], 1 }
 0xda2   :  { %2188 = vsyncpa [#allocation5], 1 }
 0xda3   :  { %2190 = vsyncpa [#allocation5 + $0x1], 1 }

</bundles_post_ra>
